<compile_context>
chip_gen: v7x
topology: tpu7x:2x2x1
jax: 0.10.0
libtpu: 0.0.40
codegen_flags: <defaults>
</compile_context>

<pallas_src>
import functools
import math

import jax
import jax.numpy as jnp
from jax.experimental import pallas as pl
from jax.experimental.pallas import tpu as pltpu

EPS = 1e-5


# --------------------------- tiling / VMEM planning ---------------------------
def _vmem_plan():
    """(working-set budget, scoped-vmem limit) in bytes, generation-aware."""
    try:
        cap = int(pltpu.get_tpu_info().vmem_capacity_bytes)
    except Exception:
        cap = 32 << 20                      # conservative fallback (fits v3..v7x)
    budget = min(cap // 3, 28 << 20)        # target <= ~24-28 MiB everywhere
    limit = min(cap // 2, 48 << 20)         # > v5e's 16 MiB default, < v7x physical
    return budget, limit


def _conv_working_set(th, W, C):
    tile = th * W * C
    win = 3 * (th + 2) * W * C * 2          # kw-pre-shifted bf16 window scratch
    x_in = 2 * (tile + 2 * W * C) * 4       # double-buffered mid + halo inputs (f32 worst case)
    y_out = 2 * tile * 2                    # double-buffered bf16 conv output
    w = 2 * 9 * C * C * 2                   # double-buffered bf16 taps
    temps = 4 * tile * 4                    # f32 acc + a few live values in the body
    return win + x_in + y_out + w + temps + (256 << 10)


def _pick_tile_rows(N, H, W, C, budget):
    """Largest divisor of H whose full per-step working set fits `budget`, while
    keeping the 1-D grid >= 8 steps (when possible) so both v7x TensorCores and
    the double-buffered DMA pipeline stay busy."""
    NH = N * H
    divisors = [d for d in range(1, H + 1) if H % d == 0]
    feasible = [d for d in divisors if _conv_working_set(d, W, C) <= budget] or [1]
    min_steps = 8 if NH >= 8 else 1
    balanced = [d for d in feasible if NH // d >= min_steps]
    return max(balanced) if balanced else min(feasible)


def _pick_row_tile(rows, max_rows, min_steps=8):
    """Multiple-of-8 divisor of `rows` under `max_rows`, preferring >= min_steps steps."""
    divs = [d for d in range(8, rows + 1, 8) if rows % d == 0 and d <= max_rows]
    if not divs:
        return rows                         # full-extent block is always legal
    good = [d for d in divs if rows // d >= min_steps]
    return max(good) if good else max(divs)


# --------------------------------- conv stage ---------------------------------
def _conv_kernel(top_ref, mid_ref, bot_ref, scale_ref, bias_ref, w_ref, b_ref,
                 y_ref, st_ref, win_ref, *, TH, W, H, pre_norm, fat_k):
    """One grid step: 3x3 'same' conv (+bias) over TH output rows of one image.

    Row-flattened layout: flat row = (n*H + h)*W + w, lanes = channels.
      top_ref/bot_ref: (W, C)      1-row halo above/below (clamped; zeroed at image
                                   boundaries == 'same' zero padding).
      mid_ref        : (TH*W, C)   the tile's own rows (f32 x for stage 1, bf16 y1
                                   for stage 2).
      scale/bias_ref : (1, C) f32  folded BN affine of the previous stage (only
                                   used when pre_norm=True).
      w_ref          : bf16 taps;  (3, 3C, C) when fat_k else (9, C, C).
      b_ref          : (1, C) f32  conv bias.
    Outputs:
      y_ref : (TH*W, C) bf16  conv + bias (pre-BN), stored bf16 to halve HBM bytes.
      st_ref: (1, 2, C) f32   rows 0/1 = per-channel sum / sum-of-squares (f32 acc).
    Scratch:
      win_ref: bf16 kw-pre-shifted halo window; ((TH+2)*W, 3C) when fat_k else
               (3, (TH+2)*W, C).  Every conv tap is an aligned ref slice of it.
    """
    C = b_ref.shape[-1]

    t = pl.program_id(0)
    tiles_per_image = H // TH
    top_keep = jnp.where(t % tiles_per_image == 0, 0.0, 1.0)
    bot_keep = jnp.where((t + 1) % tiles_per_image == 0, 0.0, 1.0)

    def pre(v):
        # Stage-2 fusion: previous BN affine + SiLU applied on the fly (incl. the
        # halo rows) so the activated intermediate never exists in HBM.
        v = v.astype(jnp.float32)
        if pre_norm:
            v = v * scale_ref[...] + bias_ref[...]
            v = v * jax.nn.sigmoid(v)
        return v

    def put(r0, v):
        """Store the three kw-shifted, edge-masked variants of slab `v` into the
        scratch window.  jnp.roll here is a per-slab XLU sublane rotate; the rows
        that wrap across the slab edge are exactly the (col==0 / col==W-1) rows
        zeroed by the masks (the 'same'-padding columns), so per-slab rolling is
        correct — keep that invariant if this is ever rewritten."""
        rows = v.shape[0]
        col = jax.lax.broadcasted_iota(
            jnp.int32, (rows // W, W, 1), 1).reshape(rows, 1)
        left = jnp.where(col > 0, jnp.roll(v, 1, axis=0), 0.0).astype(jnp.bfloat16)
        cent = v.astype(jnp.bfloat16)
        right = jnp.where(col < W - 1, jnp.roll(v, -1, axis=0), 0.0).astype(jnp.bfloat16)
        if fat_k:   # im2col lanes (kw-major); aligned because C % 128 == 0
            win_ref[r0:r0 + rows, :] = jnp.concatenate([left, cent, right], axis=-1)
        else:       # small C: keep stores full-lane dense on the minor axis
            win_ref[0, r0:r0 + rows, :] = left
            win_ref[1, r0:r0 + rows, :] = cent
            win_ref[2, r0:r0 + rows, :] = right

    put(0, pre(top_ref[...]) * top_keep)
    put(W, pre(mid_ref[...]))
    put((TH + 1) * W, pre(bot_ref[...]) * bot_keep)

    acc = jnp.zeros((TH * W, C), jnp.float32)
    if fat_k:
        for kh in range(3):                         # 3 dots, K = 3C (fills the MXU)
            acc += jnp.dot(win_ref[kh * W:kh * W + TH * W, :], w_ref[kh],
                           preferred_element_type=jnp.float32)
    else:
        for kh in range(3):                         # 9 dots, K = C (small C path)
            for kw in range(3):
                acc += jnp.dot(win_ref[kw, kh * W:kh * W + TH * W, :],
                               w_ref[kh * 3 + kw],
                               preferred_element_type=jnp.float32)
    acc = acc + b_ref[...]

    y_ref[...] = acc.astype(y_ref.dtype)
    # Single-pass BN statistics for this tile (reduced across tiles outside).
    s1 = jnp.sum(acc, axis=0, keepdims=True)
    s2 = jnp.sum(acc * acc, axis=0, keepdims=True)
    st_ref[...] = jnp.concatenate([s1, s2], axis=0).reshape(1, 2, C)


def _conv_stage(x_flat, scale, bias, w_taps, b, *, N, H, W, C, TH, pre_norm,
                fat_k, vmem_limit):
    NH = N * H
    G = NH // TH
    RW = TH * W
    R = NH * W

    top_map = lambda t: (jnp.maximum(t * TH - 1, 0), 0)
    mid_map = lambda t: (t, 0)
    bot_map = lambda t: (jnp.minimum((t + 1) * TH, NH - 1), 0)
    vec_map = lambda t: (0, 0)
    w_map = lambda t: (0, 0, 0)

    kernel = functools.partial(_conv_kernel, TH=TH, W=W, H=H,
                               pre_norm=pre_norm, fat_k=fat_k)

    in_bytes = x_flat.dtype.itemsize
    flops = 2 * 9 * R * C * C + (6 * R * C if pre_norm else 0)
    transcendentals = R * C if pre_norm else 0
    bytes_accessed = (R * C * (in_bytes + 2) + 9 * C * C * 2
                      + G * (2 * C * 4 + 2 * W * C * in_bytes))

    if fat_k:
        w_spec = pl.BlockSpec((3, 3 * C, C), w_map)
        win_scratch = pltpu.VMEM(((TH + 2) * W, 3 * C), jnp.bfloat16)
    else:
        w_spec = pl.BlockSpec((9, C, C), w_map)
        win_scratch = pltpu.VMEM((3, (TH + 2) * W, C), jnp.bfloat16)

    y, st = pl.pallas_call(
        kernel,
        grid=(G,),
        in_specs=[
            pl.BlockSpec((W, C), top_map),       # top halo row (clamped)
            pl.BlockSpec((RW, C), mid_map),      # tile rows
            pl.BlockSpec((W, C), bot_map),       # bottom halo row (clamped)
            pl.BlockSpec((1, C), vec_map),       # prev-stage BN scale
            pl.BlockSpec((1, C), vec_map),       # prev-stage BN bias
            w_spec,                              # conv taps (bf16)
            pl.BlockSpec((1, C), vec_map),       # conv bias
        ],
        out_specs=[
            pl.BlockSpec((RW, C), mid_map),
            pl.BlockSpec((1, 2, C), lambda t: (t, 0, 0)),
        ],
        out_shape=[
            jax.ShapeDtypeStruct((R, C), jnp.bfloat16),
            jax.ShapeDtypeStruct((G, 2, C), jnp.float32),
        ],
        scratch_shapes=[win_scratch],
        compiler_params=pltpu.CompilerParams(
            dimension_semantics=("parallel",),
            vmem_limit_bytes=vmem_limit),
        cost_estimate=pl.CostEstimate(flops=flops,
                                      transcendentals=transcendentals,
                                      bytes_accessed=bytes_accessed),
    )(x_flat, x_flat, x_flat, scale, bias, w_taps, b)
    return y, st


# -------------------------------- finalize stage -------------------------------
def _finalize_kernel(y_ref, idn_ref, scale_ref, bias_ref, o_ref):
    """BN2 affine + residual add + SiLU on a lane-dense repacked view."""
    a = (y_ref[...].astype(jnp.float32) * scale_ref[...] + bias_ref[...]
         + idn_ref[...])
    o_ref[...] = a * jax.nn.sigmoid(a)


def _finalize_stage(y2, idn, scale, bias, *, R, C, budget, vmem_limit):
    # Repack the elementwise epilogue to (rows, L) with L a multiple of 128 so the
    # loads/stores are full-lane even when C < 128; the per-channel affine is tiled
    # to match.  Falls back to the (R, C) layout if R*C doesn't pack evenly.
    L = (C * 128) // math.gcd(C, 128)
    if (R * C) % L == 0:
        rows, k = (R * C) // L, L // C
        y2v, idnv = y2.reshape(rows, L), idn.reshape(rows, L)
        scale_v, bias_v = jnp.tile(scale, (1, k)), jnp.tile(bias, (1, k))
    else:
        rows, L = R, C
        y2v, idnv, scale_v, bias_v = y2, idn, scale, bias

    TR = _pick_row_tile(rows, max(budget // (24 * L), 8))
    G = rows // TR if rows % TR == 0 else 1
    TR = TR if rows % TR == 0 else rows
    mid_map = lambda t: (t, 0)
    vec_map = lambda t: (0, 0)

    out = pl.pallas_call(
        _finalize_kernel,
        grid=(G,),
        in_specs=[pl.BlockSpec((TR, L), mid_map),
                  pl.BlockSpec((TR, L), mid_map),
                  pl.BlockSpec((1, L), vec_map),
                  pl.BlockSpec((1, L), vec_map)],
        out_specs=pl.BlockSpec((TR, L), mid_map),
        out_shape=jax.ShapeDtypeStruct((rows, L), jnp.float32),
        compiler_params=pltpu.CompilerParams(
            dimension_semantics=("parallel",),
            vmem_limit_bytes=vmem_limit),
        cost_estimate=pl.CostEstimate(flops=5 * R * C,
                                      transcendentals=R * C,
                                      bytes_accessed=(2 + 4 + 4) * R * C),
    )(y2v, idnv, scale_v, bias_v)
    return out.reshape(R, C)


# ------------------------------------ BN fold ----------------------------------
def _bn_affine(stats, count, gamma, beta):
    """Fold global training-mode BN stats (biased var, eps=1e-5) into y*scale+bias."""
    s = jnp.sum(stats[:, 0, :], axis=0)
    sq = jnp.sum(stats[:, 1, :], axis=0)
    mean = s / count
    var = jnp.maximum(sq / count - mean * mean, 0.0)
    inv = jax.lax.rsqrt(var + EPS)
    scale = gamma * inv
    bias = beta - mean * scale
    return (scale.reshape(1, -1).astype(jnp.float32),
            bias.reshape(1, -1).astype(jnp.float32))


# ----------------------------------- wrapper -----------------------------------
@jax.jit
def res_block_2d(x_nchw, params):
    """x_nchw: (N, C, H, W) float32 -> (N, C, H, W) float32."""
    x = jnp.transpose(x_nchw, (0, 2, 3, 1)).astype(jnp.float32)  # NHWC
    N, H, W, C = x.shape
    if W % 8 != 0:
        raise NotImplementedError("res_block_2d requires W % 8 == 0")

    budget, vmem_limit = _vmem_plan()
    TH = _pick_tile_rows(N, H, W, C, budget)
    R = N * H * W
    fat_k = (C % 128 == 0)          # K=3C im2col path needs 128-aligned lane blocks

    def prep_w(w):   # torch (Cout, Cin, 3, 3) -> bf16 taps in the kernel layout
        w = jnp.transpose(w, (2, 3, 1, 0)).astype(jnp.bfloat16)  # (kh, kw, Cin, Cout)
        return w.reshape(3, 3 * C, C) if fat_k else w.reshape(9, C, C)

    def prep_v(v):
        return v.reshape(1, C).astype(jnp.float32)

    w1, b1 = prep_w(params["conv1_w"]), prep_v(params["conv1_b"])
    w2, b2 = prep_w(params["conv2_w"]), prep_v(params["conv2_b"])
    g1, bt1 = params["bn1_g"].astype(jnp.float32), params["bn1_b"].astype(jnp.float32)
    g2, bt2 = params["bn2_g"].astype(jnp.float32), params["bn2_b"].astype(jnp.float32)

    x_flat = x.reshape(R, C)
    ones = jnp.ones((1, C), jnp.float32)
    zeros = jnp.zeros((1, C), jnp.float32)

    # Stage 1: conv1 + bias (bf16 MXU, f32 acc), per-tile BN statistics.
    y1, st1 = _conv_stage(x_flat, ones, zeros, w1, b1, N=N, H=H, W=W, C=C, TH=TH,
                          pre_norm=False, fat_k=fat_k, vmem_limit=vmem_limit)
    scale1, bias1 = _bn_affine(st1, R, g1, bt1)

    # Stage 2: BN1 affine + SiLU fused into conv2's window assembly, conv2 + bias.
    y2, st2 = _conv_stage(y1, scale1, bias1, w2, b2, N=N, H=H, W=W, C=C, TH=TH,
                          pre_norm=True, fat_k=fat_k, vmem_limit=vmem_limit)
    scale2, bias2 = _bn_affine(st2, R, g2, bt2)

    # Finalize: BN2 affine + residual + SiLU on a lane-dense repacked view.
    out_flat = _finalize_stage(y2, x_flat, scale2, bias2, R=R, C=C,
                               budget=budget, vmem_limit=vmem_limit)
    out = out_flat.reshape(N, H, W, C)
    return jnp.transpose(out, (0, 3, 1, 2))  # -> NCHW


# ----------------------- pure-JAX reference (for check) -----------------------
def _ref_conv_bn(x_nhwc, w_oihw, b, g, bt):
    w = jnp.transpose(w_oihw, (2, 3, 1, 0))
    xpad = jnp.pad(x_nhwc, ((0, 0), (1, 1), (1, 1), (0, 0)))
    N, Hp, Wp, C = xpad.shape
    H, W = Hp - 2, Wp - 2
    acc = jnp.zeros((N, H, W, C), jnp.float32)
    for kh in range(3):
        for kw in range(3):
            acc = acc + jnp.einsum("nhwc,cd->nhwd",
                                   xpad[:, kh:kh + H, kw:kw + W, :], w[kh, kw])
    acc = acc + b.reshape(1, 1, 1, C)
    mean = acc.mean(axis=(0, 1, 2), keepdims=True)
    var = ((acc - mean) ** 2).mean(axis=(0, 1, 2), keepdims=True)
    return ((acc - mean) * jax.lax.rsqrt(var + EPS) * g.reshape(1, 1, 1, C)
            + bt.reshape(1, 1, 1, C))


def _ref_res_block(x_nchw, p):
    x = jnp.transpose(x_nchw, (0, 2, 3, 1))
    o = _ref_conv_bn(x, p["conv1_w"], p["conv1_b"], p["bn1_g"], p["bn1_b"])
    o = o * jax.nn.sigmoid(o)
    o = _ref_conv_bn(o, p["conv2_w"], p["conv2_b"], p["bn2_g"], p["bn2_b"])
    o = o + x
    o = o * jax.nn.sigmoid(o)
    return jnp.transpose(o, (0, 3, 1, 2))


if __name__ == "__main__":
    N, C, H, W = 2, 4, 16, 16
    key = jax.random.PRNGKey(0)
    ks = jax.random.split(key, 9)

    x = jax.random.normal(ks[0], (N, C, H, W), jnp.float32)
    params = {
        "conv1_w": 0.1 * jax.random.normal(ks[1], (C, C, 3, 3), jnp.float32),
        "conv1_b": 0.1 * jax.random.normal(ks[2], (C,), jnp.float32),
        "bn1_g": 1.0 + 0.1 * jax.random.normal(ks[3], (C,), jnp.float32),
        "bn1_b": 0.1 * jax.random.normal(ks[4], (C,), jnp.float32),
        "conv2_w": 0.1 * jax.random.normal(ks[5], (C, C, 3, 3), jnp.float32),
        "conv2_b": 0.1 * jax.random.normal(ks[6], (C,), jnp.float32),
        "bn2_g": 1.0 + 0.1 * jax.random.normal(ks[7], (C,), jnp.float32),
        "bn2_b": 0.1 * jax.random.normal(ks[8], (C,), jnp.float32),
    }

    out = jax.block_until_ready(res_block_2d(x, params))
    ref = jax.block_until_ready(_ref_res_block(x, params))

    assert out.shape == (N, C, H, W), out.shape
    # bf16 MXU operands + bf16 inter-stage intermediates => bf16-level tolerance
    # against the pure-f32 reference.
    err = float(jnp.max(jnp.abs(out - ref)))
    assert jnp.allclose(out, ref, atol=5e-2, rtol=2e-2), err
    print("KERNEL_OK")
</pallas_src>

<mosaic_0001>
module attributes {stable_mosaic.version = 11 : i64} {
  func.func @_conv_kernel(%arg0: i32, %arg1: memref<16x4xf32, #tpu.memory_space<vmem>>, %arg2: memref<64x4xf32, #tpu.memory_space<vmem>>, %arg3: memref<16x4xf32, #tpu.memory_space<vmem>>, %arg4: memref<1x4xf32, #tpu.memory_space<vmem>>, %arg5: memref<1x4xf32, #tpu.memory_space<vmem>>, %arg6: memref<9x4x4xbf16, #tpu.memory_space<vmem>>, %arg7: memref<1x4xf32, #tpu.memory_space<vmem>>, %arg8: memref<64x4xbf16, #tpu.memory_space<vmem>>, %arg9: memref<1x2x4xf32, #tpu.memory_space<vmem>>, %arg10: memref<3x96x4xbf16, #tpu.memory_space<vmem>>) attributes {dimension_semantics = [#tpu.dimension_semantics<parallel>], iteration_bounds = array<i64: 8>, scalar_prefetch = 0 : i64, scratch_operands = 1 : i64, tpu.core_type = #tpu.core_type<tc>, window_params = [{transform_indices = @transform_0, window_bounds = array<i64: 16, 4>}, {transform_indices = @transform_1, window_bounds = array<i64: 64, 4>}, {transform_indices = @transform_2, window_bounds = array<i64: 16, 4>}, {pipeline_mode = #tpu.pipeline_mode<synchronous>, transform_indices = @transform_3, window_bounds = array<i64: 1, 4>}, {pipeline_mode = #tpu.pipeline_mode<synchronous>, transform_indices = @transform_4, window_bounds = array<i64: 1, 4>}, {pipeline_mode = #tpu.pipeline_mode<synchronous>, transform_indices = @transform_5, window_bounds = array<i64: 9, 4, 4>}, {pipeline_mode = #tpu.pipeline_mode<synchronous>, transform_indices = @transform_6, window_bounds = array<i64: 1, 4>}, {transform_indices = @transform_7, window_bounds = array<i64: 64, 4>}, {transform_indices = @transform_8, window_bounds = array<i64: 1, 2, 4>}]} {
    %c4_i32 = arith.constant 4 : i32
    %c0_i32 = arith.constant 0 : i32
    %0 = arith.cmpi eq, %c4_i32, %c0_i32 : i32
    %c1_i32 = arith.constant 1 : i32
    %1 = arith.select %0, %c1_i32, %c4_i32 : i32
    %2 = arith.remsi %arg0, %1 : i32
    %c0_i32_0 = arith.constant 0 : i32
    %3 = arith.cmpi ne, %2, %c0_i32_0 : i32
    %c0_i32_1 = arith.constant 0 : i32
    %4 = arith.cmpi slt, %2, %c0_i32_1 : i32
    %c0_i32_2 = arith.constant 0 : i32
    %5 = arith.cmpi slt, %1, %c0_i32_2 : i32
    %6 = arith.xori %4, %5 : i1
    %7 = arith.andi %6, %3 : i1
    %8 = arith.addi %2, %1 : i32
    %9 = arith.select %7, %8, %2 : i32
    %c0_i32_3 = arith.constant 0 : i32
    %10 = arith.cmpi eq, %9, %c0_i32_3 : i32
    %cst = arith.constant 0.000000e+00 : f32
    %cst_4 = arith.constant 1.000000e+00 : f32
    %11 = arith.select %10, %cst, %cst_4 : f32
    %c1_i32_5 = arith.constant 1 : i32
    %12 = arith.addi %arg0, %c1_i32_5 : i32
    %c4_i32_6 = arith.constant 4 : i32
    %c0_i32_7 = arith.constant 0 : i32
    %13 = arith.cmpi eq, %c4_i32_6, %c0_i32_7 : i32
    %c1_i32_8 = arith.constant 1 : i32
    %14 = arith.select %13, %c1_i32_8, %c4_i32_6 : i32
    %15 = arith.remsi %12, %14 : i32
    %c0_i32_9 = arith.constant 0 : i32
    %16 = arith.cmpi ne, %15, %c0_i32_9 : i32
    %c0_i32_10 = arith.constant 0 : i32
    %17 = arith.cmpi slt, %15, %c0_i32_10 : i32
    %c0_i32_11 = arith.constant 0 : i32
    %18 = arith.cmpi slt, %14, %c0_i32_11 : i32
    %19 = arith.xori %17, %18 : i1
    %20 = arith.andi %19, %16 : i1
    %21 = arith.addi %15, %14 : i32
    %22 = arith.select %20, %21, %15 : i32
    %c0_i32_12 = arith.constant 0 : i32
    %23 = arith.cmpi eq, %22, %c0_i32_12 : i32
    %cst_13 = arith.constant 0.000000e+00 : f32
    %cst_14 = arith.constant 1.000000e+00 : f32
    %24 = arith.select %23, %cst_13, %cst_14 : f32
    %c0 = arith.constant 0 : index
    %c0_15 = arith.constant 0 : index
    %25 = vector.load %arg1[%c0, %c0_15] : memref<16x4xf32, #tpu.memory_space<vmem>>, vector<16x4xf32>
    %26 = vector.broadcast %11 : f32 to vector<16x4xf32>
    %27 = arith.mulf %25, %26 : vector<16x4xf32>
    %28 = tpu.iota {dimensions = array<i32: 1>} : vector<1x16x1xi32>
    %29 = vector.shape_cast %28 : vector<1x16x1xi32> to vector<16x1xi32>
    %c0_i32_16 = arith.constant 0 : i32
    %30 = vector.broadcast %c0_i32_16 : i32 to vector<16x1xi32>
    %31 = arith.cmpi sgt, %29, %30 : vector<16x1xi32>
    %32 = vector.extract_strided_slice %27 {offsets = [15, 0], sizes = [1, 4], strides = [1, 1]} : vector<16x4xf32> to vector<1x4xf32>
    %33 = vector.extract_strided_slice %27 {offsets = [0, 0], sizes = [15, 4], strides = [1, 1]} : vector<16x4xf32> to vector<15x4xf32>
    %34 = tpu.concatenate %32, %33 in 0 : vector<1x4xf32>, vector<15x4xf32> -> vector<16x4xf32>
    %cst_17 = arith.constant 0.000000e+00 : f32
    %35 = vector.shape_cast %31 : vector<16x1xi1> to vector<16x1xi1>
    %36 = vector.broadcast %35 : vector<16x1xi1> to vector<16x4xi1>
    %37 = vector.broadcast %cst_17 : f32 to vector<16x4xf32>
    %38 = arith.select %36, %34, %37 : vector<16x4xi1>, vector<16x4xf32>
    %39 = arith.truncf %38 : vector<16x4xf32> to vector<16x4xbf16>
    %40 = arith.truncf %27 : vector<16x4xf32> to vector<16x4xbf16>
    %c15_i32 = arith.constant 15 : i32
    %41 = vector.broadcast %c15_i32 : i32 to vector<16x1xi32>
    %42 = arith.cmpi slt, %29, %41 : vector<16x1xi32>
    %43 = vector.extract_strided_slice %27 {offsets = [1, 0], sizes = [15, 4], strides = [1, 1]} : vector<16x4xf32> to vector<15x4xf32>
    %44 = vector.extract_strided_slice %27 {offsets = [0, 0], sizes = [1, 4], strides = [1, 1]} : vector<16x4xf32> to vector<1x4xf32>
    %45 = tpu.concatenate %43, %44 in 0 : vector<15x4xf32>, vector<1x4xf32> -> vector<16x4xf32>
    %cst_18 = arith.constant 0.000000e+00 : f32
    %46 = vector.shape_cast %42 : vector<16x1xi1> to vector<16x1xi1>
    %47 = vector.broadcast %46 : vector<16x1xi1> to vector<16x4xi1>
    %48 = vector.broadcast %cst_18 : f32 to vector<16x4xf32>
    %49 = arith.select %47, %45, %48 : vector<16x4xi1>, vector<16x4xf32>
    %50 = arith.truncf %49 : vector<16x4xf32> to vector<16x4xbf16>
    %c0_19 = arith.constant 0 : index
    %c0_20 = arith.constant 0 : index
    %c0_21 = arith.constant 0 : index
    %51 = vector.load %arg10[%c0_19, %c0_20, %c0_21] : memref<3x96x4xbf16, #tpu.memory_space<vmem>>, vector<1x16x4xbf16>
    %52 = vector.shape_cast %51 : vector<1x16x4xbf16> to vector<16x4xbf16>
    %53 = vector.shape_cast %39 : vector<16x4xbf16> to vector<1x16x4xbf16>
    tpu.vector_store %arg10[%c0_19, %c0_20, %c0_21], %53 {strides = array<i32>} : memref<3x96x4xbf16, #tpu.memory_space<vmem>>, vector<1x16x4xbf16>,
    %c1 = arith.constant 1 : index
    %c0_22 = arith.constant 0 : index
    %c0_23 = arith.constant 0 : index
    %54 = vector.load %arg10[%c1, %c0_22, %c0_23] : memref<3x96x4xbf16, #tpu.memory_space<vmem>>, vector<1x16x4xbf16>
    %55 = vector.shape_cast %54 : vector<1x16x4xbf16> to vector<16x4xbf16>
    %56 = vector.shape_cast %40 : vector<16x4xbf16> to vector<1x16x4xbf16>
    tpu.vector_store %arg10[%c1, %c0_22, %c0_23], %56 {strides = array<i32>} : memref<3x96x4xbf16, #tpu.memory_space<vmem>>, vector<1x16x4xbf16>,
    %c2 = arith.constant 2 : index
    %c0_24 = arith.constant 0 : index
    %c0_25 = arith.constant 0 : index
    %57 = vector.load %arg10[%c2, %c0_24, %c0_25] : memref<3x96x4xbf16, #tpu.memory_space<vmem>>, vector<1x16x4xbf16>
    %58 = vector.shape_cast %57 : vector<1x16x4xbf16> to vector<16x4xbf16>
    %59 = vector.shape_cast %50 : vector<16x4xbf16> to vector<1x16x4xbf16>
    tpu.vector_store %arg10[%c2, %c0_24, %c0_25], %59 {strides = array<i32>} : memref<3x96x4xbf16, #tpu.memory_space<vmem>>, vector<1x16x4xbf16>,
    %c0_26 = arith.constant 0 : index
    %c0_27 = arith.constant 0 : index
    %60 = vector.load %arg2[%c0_26, %c0_27] : memref<64x4xf32, #tpu.memory_space<vmem>>, vector<64x4xf32>
    %61 = tpu.iota {dimensions = array<i32: 1>} : vector<4x16x1xi32>
    %62 = vector.shape_cast %61 : vector<4x16x1xi32> to vector<64x1xi32>
    %c0_i32_28 = arith.constant 0 : i32
    %63 = vector.broadcast %c0_i32_28 : i32 to vector<64x1xi32>
    %64 = arith.cmpi sgt, %62, %63 : vector<64x1xi32>
    %65 = vector.extract_strided_slice %60 {offsets = [63, 0], sizes = [1, 4], strides = [1, 1]} : vector<64x4xf32> to vector<1x4xf32>
    %66 = vector.extract_strided_slice %60 {offsets = [0, 0], sizes = [63, 4], strides = [1, 1]} : vector<64x4xf32> to vector<63x4xf32>
    %67 = tpu.concatenate %65, %66 in 0 : vector<1x4xf32>, vector<63x4xf32> -> vector<64x4xf32>
    %cst_29 = arith.constant 0.000000e+00 : f32
    %68 = vector.shape_cast %64 : vector<64x1xi1> to vector<64x1xi1>
    %69 = vector.broadcast %68 : vector<64x1xi1> to vector<64x4xi1>
    %70 = vector.broadcast %cst_29 : f32 to vector<64x4xf32>
    %71 = arith.select %69, %67, %70 : vector<64x4xi1>, vector<64x4xf32>
    %72 = arith.truncf %71 : vector<64x4xf32> to vector<64x4xbf16>
    %73 = arith.truncf %60 : vector<64x4xf32> to vector<64x4xbf16>
    %c15_i32_30 = arith.constant 15 : i32
    %74 = vector.broadcast %c15_i32_30 : i32 to vector<64x1xi32>
    %75 = arith.cmpi slt, %62, %74 : vector<64x1xi32>
    %76 = vector.extract_strided_slice %60 {offsets = [1, 0], sizes = [63, 4], strides = [1, 1]} : vector<64x4xf32> to vector<63x4xf32>
    %77 = vector.extract_strided_slice %60 {offsets = [0, 0], sizes = [1, 4], strides = [1, 1]} : vector<64x4xf32> to vector<1x4xf32>
    %78 = tpu.concatenate %76, %77 in 0 : vector<63x4xf32>, vector<1x4xf32> -> vector<64x4xf32>
    %cst_31 = arith.constant 0.000000e+00 : f32
    %79 = vector.shape_cast %75 : vector<64x1xi1> to vector<64x1xi1>
    %80 = vector.broadcast %79 : vector<64x1xi1> to vector<64x4xi1>
    %81 = vector.broadcast %cst_31 : f32 to vector<64x4xf32>
    %82 = arith.select %80, %78, %81 : vector<64x4xi1>, vector<64x4xf32>
    %83 = arith.truncf %82 : vector<64x4xf32> to vector<64x4xbf16>
    %c0_32 = arith.constant 0 : index
    %c16 = arith.constant 16 : index
    %c0_33 = arith.constant 0 : index
    %84 = vector.load %arg10[%c0_32, %c16, %c0_33] : memref<3x96x4xbf16, #tpu.memory_space<vmem>>, vector<1x64x4xbf16>
    %85 = vector.shape_cast %84 : vector<1x64x4xbf16> to vector<64x4xbf16>
    %86 = vector.shape_cast %72 : vector<64x4xbf16> to vector<1x64x4xbf16>
    tpu.vector_store %arg10[%c0_32, %c16, %c0_33], %86 {strides = array<i32>} : memref<3x96x4xbf16, #tpu.memory_space<vmem>>, vector<1x64x4xbf16>,
    %c1_34 = arith.constant 1 : index
    %c16_35 = arith.constant 16 : index
    %c0_36 = arith.constant 0 : index
    %87 = vector.load %arg10[%c1_34, %c16_35, %c0_36] : memref<3x96x4xbf16, #tpu.memory_space<vmem>>, vector<1x64x4xbf16>
    %88 = vector.shape_cast %87 : vector<1x64x4xbf16> to vector<64x4xbf16>
    %89 = vector.shape_cast %73 : vector<64x4xbf16> to vector<1x64x4xbf16>
    tpu.vector_store %arg10[%c1_34, %c16_35, %c0_36], %89 {strides = array<i32>} : memref<3x96x4xbf16, #tpu.memory_space<vmem>>, vector<1x64x4xbf16>,
    %c2_37 = arith.constant 2 : index
    %c16_38 = arith.constant 16 : index
    %c0_39 = arith.constant 0 : index
    %90 = vector.load %arg10[%c2_37, %c16_38, %c0_39] : memref<3x96x4xbf16, #tpu.memory_space<vmem>>, vector<1x64x4xbf16>
    %91 = vector.shape_cast %90 : vector<1x64x4xbf16> to vector<64x4xbf16>
    %92 = vector.shape_cast %83 : vector<64x4xbf16> to vector<1x64x4xbf16>
    tpu.vector_store %arg10[%c2_37, %c16_38, %c0_39], %92 {strides = array<i32>} : memref<3x96x4xbf16, #tpu.memory_space<vmem>>, vector<1x64x4xbf16>,
    %c0_40 = arith.constant 0 : index
    %c0_41 = arith.constant 0 : index
    %93 = vector.load %arg3[%c0_40, %c0_41] : memref<16x4xf32, #tpu.memory_space<vmem>>, vector<16x4xf32>
    %94 = vector.broadcast %24 : f32 to vector<16x4xf32>
    %95 = arith.mulf %93, %94 : vector<16x4xf32>
    %96 = tpu.iota {dimensions = array<i32: 1>} : vector<1x16x1xi32>
    %97 = vector.shape_cast %96 : vector<1x16x1xi32> to vector<16x1xi32>
    %c0_i32_42 = arith.constant 0 : i32
    %98 = vector.broadcast %c0_i32_42 : i32 to vector<16x1xi32>
    %99 = arith.cmpi sgt, %97, %98 : vector<16x1xi32>
    %100 = vector.extract_strided_slice %95 {offsets = [15, 0], sizes = [1, 4], strides = [1, 1]} : vector<16x4xf32> to vector<1x4xf32>
    %101 = vector.extract_strided_slice %95 {offsets = [0, 0], sizes = [15, 4], strides = [1, 1]} : vector<16x4xf32> to vector<15x4xf32>
    %102 = tpu.concatenate %100, %101 in 0 : vector<1x4xf32>, vector<15x4xf32> -> vector<16x4xf32>
    %cst_43 = arith.constant 0.000000e+00 : f32
    %103 = vector.shape_cast %99 : vector<16x1xi1> to vector<16x1xi1>
    %104 = vector.broadcast %103 : vector<16x1xi1> to vector<16x4xi1>
    %105 = vector.broadcast %cst_43 : f32 to vector<16x4xf32>
    %106 = arith.select %104, %102, %105 : vector<16x4xi1>, vector<16x4xf32>
    %107 = arith.truncf %106 : vector<16x4xf32> to vector<16x4xbf16>
    %108 = arith.truncf %95 : vector<16x4xf32> to vector<16x4xbf16>
    %c15_i32_44 = arith.constant 15 : i32
    %109 = vector.broadcast %c15_i32_44 : i32 to vector<16x1xi32>
    %110 = arith.cmpi slt, %97, %109 : vector<16x1xi32>
    %111 = vector.extract_strided_slice %95 {offsets = [1, 0], sizes = [15, 4], strides = [1, 1]} : vector<16x4xf32> to vector<15x4xf32>
    %112 = vector.extract_strided_slice %95 {offsets = [0, 0], sizes = [1, 4], strides = [1, 1]} : vector<16x4xf32> to vector<1x4xf32>
    %113 = tpu.concatenate %111, %112 in 0 : vector<15x4xf32>, vector<1x4xf32> -> vector<16x4xf32>
    %cst_45 = arith.constant 0.000000e+00 : f32
    %114 = vector.shape_cast %110 : vector<16x1xi1> to vector<16x1xi1>
    %115 = vector.broadcast %114 : vector<16x1xi1> to vector<16x4xi1>
    %116 = vector.broadcast %cst_45 : f32 to vector<16x4xf32>
    %117 = arith.select %115, %113, %116 : vector<16x4xi1>, vector<16x4xf32>
    %118 = arith.truncf %117 : vector<16x4xf32> to vector<16x4xbf16>
    %c0_46 = arith.constant 0 : index
    %c80 = arith.constant 80 : index
    %c0_47 = arith.constant 0 : index
    %119 = vector.load %arg10[%c0_46, %c80, %c0_47] : memref<3x96x4xbf16, #tpu.memory_space<vmem>>, vector<1x16x4xbf16>
    %120 = vector.shape_cast %119 : vector<1x16x4xbf16> to vector<16x4xbf16>
    %121 = vector.shape_cast %107 : vector<16x4xbf16> to vector<1x16x4xbf16>
    tpu.vector_store %arg10[%c0_46, %c80, %c0_47], %121 {strides = array<i32>} : memref<3x96x4xbf16, #tpu.memory_space<vmem>>, vector<1x16x4xbf16>,
    %c1_48 = arith.constant 1 : index
    %c80_49 = arith.constant 80 : index
    %c0_50 = arith.constant 0 : index
    %122 = vector.load %arg10[%c1_48, %c80_49, %c0_50] : memref<3x96x4xbf16, #tpu.memory_space<vmem>>, vector<1x16x4xbf16>
    %123 = vector.shape_cast %122 : vector<1x16x4xbf16> to vector<16x4xbf16>
    %124 = vector.shape_cast %108 : vector<16x4xbf16> to vector<1x16x4xbf16>
    tpu.vector_store %arg10[%c1_48, %c80_49, %c0_50], %124 {strides = array<i32>} : memref<3x96x4xbf16, #tpu.memory_space<vmem>>, vector<1x16x4xbf16>,
    %c2_51 = arith.constant 2 : index
    %c80_52 = arith.constant 80 : index
    %c0_53 = arith.constant 0 : index
    %125 = vector.load %arg10[%c2_51, %c80_52, %c0_53] : memref<3x96x4xbf16, #tpu.memory_space<vmem>>, vector<1x16x4xbf16>
    %126 = vector.shape_cast %125 : vector<1x16x4xbf16> to vector<16x4xbf16>
    %127 = vector.shape_cast %118 : vector<16x4xbf16> to vector<1x16x4xbf16>
    tpu.vector_store %arg10[%c2_51, %c80_52, %c0_53], %127 {strides = array<i32>} : memref<3x96x4xbf16, #tpu.memory_space<vmem>>, vector<1x16x4xbf16>,
    %cst_54 = arith.constant 0.000000e+00 : f32
    %128 = vector.broadcast %cst_54 : f32 to vector<64x4xf32>
    %c0_55 = arith.constant 0 : index
    %c0_56 = arith.constant 0 : index
    %c0_57 = arith.constant 0 : index
    %129 = vector.load %arg10[%c0_55, %c0_56, %c0_57] : memref<3x96x4xbf16, #tpu.memory_space<vmem>>, vector<1x64x4xbf16>
    %130 = vector.shape_cast %129 : vector<1x64x4xbf16> to vector<64x4xbf16>
    %c0_58 = arith.constant 0 : index
    %c0_59 = arith.constant 0 : index
    %c0_60 = arith.constant 0 : index
    %131 = vector.load %arg6[%c0_58, %c0_59, %c0_60] : memref<9x4x4xbf16, #tpu.memory_space<vmem>>, vector<1x4x4xbf16>
    %132 = vector.shape_cast %131 : vector<1x4x4xbf16> to vector<4x4xbf16>
    %cst_61 = arith.constant dense<0.000000e+00> : vector<64x4xf32>
    %133 = tpu.matmul %130, %132, %cst_61 {dimension_numbers = #tpu.dot_dimension_numbers<[1], [0], [0], [1], [0, 0, 1, 1], [], []>} : vector<64x4xbf16>, vector<4x4xbf16>, vector<64x4xf32> -> vector<64x4xf32>
    %134 = arith.addf %128, %133 : vector<64x4xf32>
    %c1_62 = arith.constant 1 : index
    %c0_63 = arith.constant 0 : index
    %c0_64 = arith.constant 0 : index
    %135 = vector.load %arg10[%c1_62, %c0_63, %c0_64] : memref<3x96x4xbf16, #tpu.memory_space<vmem>>, vector<1x64x4xbf16>
    %136 = vector.shape_cast %135 : vector<1x64x4xbf16> to vector<64x4xbf16>
    %c1_65 = arith.constant 1 : index
    %c0_66 = arith.constant 0 : index
    %c0_67 = arith.constant 0 : index
    %137 = vector.load %arg6[%c1_65, %c0_66, %c0_67] : memref<9x4x4xbf16, #tpu.memory_space<vmem>>, vector<1x4x4xbf16>
    %138 = vector.shape_cast %137 : vector<1x4x4xbf16> to vector<4x4xbf16>
    %cst_68 = arith.constant dense<0.000000e+00> : vector<64x4xf32>
    %139 = tpu.matmul %136, %138, %cst_68 {dimension_numbers = #tpu.dot_dimension_numbers<[1], [0], [0], [1], [0, 0, 1, 1], [], []>} : vector<64x4xbf16>, vector<4x4xbf16>, vector<64x4xf32> -> vector<64x4xf32>
    %140 = arith.addf %134, %139 : vector<64x4xf32>
    %c2_69 = arith.constant 2 : index
    %c0_70 = arith.constant 0 : index
    %c0_71 = arith.constant 0 : index
    %141 = vector.load %arg10[%c2_69, %c0_70, %c0_71] : memref<3x96x4xbf16, #tpu.memory_space<vmem>>, vector<1x64x4xbf16>
    %142 = vector.shape_cast %141 : vector<1x64x4xbf16> to vector<64x4xbf16>
    %c2_72 = arith.constant 2 : index
    %c0_73 = arith.constant 0 : index
    %c0_74 = arith.constant 0 : index
    %143 = vector.load %arg6[%c2_72, %c0_73, %c0_74] : memref<9x4x4xbf16, #tpu.memory_space<vmem>>, vector<1x4x4xbf16>
    %144 = vector.shape_cast %143 : vector<1x4x4xbf16> to vector<4x4xbf16>
    %cst_75 = arith.constant dense<0.000000e+00> : vector<64x4xf32>
    %145 = tpu.matmul %142, %144, %cst_75 {dimension_numbers = #tpu.dot_dimension_numbers<[1], [0], [0], [1], [0, 0, 1, 1], [], []>} : vector<64x4xbf16>, vector<4x4xbf16>, vector<64x4xf32> -> vector<64x4xf32>
    %146 = arith.addf %140, %145 : vector<64x4xf32>
    %c0_76 = arith.constant 0 : index
    %c16_77 = arith.constant 16 : index
    %c0_78 = arith.constant 0 : index
    %147 = vector.load %arg10[%c0_76, %c16_77, %c0_78] : memref<3x96x4xbf16, #tpu.memory_space<vmem>>, vector<1x64x4xbf16>
    %148 = vector.shape_cast %147 : vector<1x64x4xbf16> to vector<64x4xbf16>
    %c3 = arith.constant 3 : index
    %c0_79 = arith.constant 0 : index
    %c0_80 = arith.constant 0 : index
    %149 = vector.load %arg6[%c3, %c0_79, %c0_80] : memref<9x4x4xbf16, #tpu.memory_space<vmem>>, vector<1x4x4xbf16>
    %150 = vector.shape_cast %149 : vector<1x4x4xbf16> to vector<4x4xbf16>
    %cst_81 = arith.constant dense<0.000000e+00> : vector<64x4xf32>
    %151 = tpu.matmul %148, %150, %cst_81 {dimension_numbers = #tpu.dot_dimension_numbers<[1], [0], [0], [1], [0, 0, 1, 1], [], []>} : vector<64x4xbf16>, vector<4x4xbf16>, vector<64x4xf32> -> vector<64x4xf32>
    %152 = arith.addf %146, %151 : vector<64x4xf32>
    %c1_82 = arith.constant 1 : index
    %c16_83 = arith.constant 16 : index
    %c0_84 = arith.constant 0 : index
    %153 = vector.load %arg10[%c1_82, %c16_83, %c0_84] : memref<3x96x4xbf16, #tpu.memory_space<vmem>>, vector<1x64x4xbf16>
    %154 = vector.shape_cast %153 : vector<1x64x4xbf16> to vector<64x4xbf16>
    %c4 = arith.constant 4 : index
    %c0_85 = arith.constant 0 : index
    %c0_86 = arith.constant 0 : index
    %155 = vector.load %arg6[%c4, %c0_85, %c0_86] : memref<9x4x4xbf16, #tpu.memory_space<vmem>>, vector<1x4x4xbf16>
    %156 = vector.shape_cast %155 : vector<1x4x4xbf16> to vector<4x4xbf16>
    %cst_87 = arith.constant dense<0.000000e+00> : vector<64x4xf32>
    %157 = tpu.matmul %154, %156, %cst_87 {dimension_numbers = #tpu.dot_dimension_numbers<[1], [0], [0], [1], [0, 0, 1, 1], [], []>} : vector<64x4xbf16>, vector<4x4xbf16>, vector<64x4xf32> -> vector<64x4xf32>
    %158 = arith.addf %152, %157 : vector<64x4xf32>
    %c2_88 = arith.constant 2 : index
    %c16_89 = arith.constant 16 : index
    %c0_90 = arith.constant 0 : index
    %159 = vector.load %arg10[%c2_88, %c16_89, %c0_90] : memref<3x96x4xbf16, #tpu.memory_space<vmem>>, vector<1x64x4xbf16>
    %160 = vector.shape_cast %159 : vector<1x64x4xbf16> to vector<64x4xbf16>
    %c5 = arith.constant 5 : index
    %c0_91 = arith.constant 0 : index
    %c0_92 = arith.constant 0 : index
    %161 = vector.load %arg6[%c5, %c0_91, %c0_92] : memref<9x4x4xbf16, #tpu.memory_space<vmem>>, vector<1x4x4xbf16>
    %162 = vector.shape_cast %161 : vector<1x4x4xbf16> to vector<4x4xbf16>
    %cst_93 = arith.constant dense<0.000000e+00> : vector<64x4xf32>
    %163 = tpu.matmul %160, %162, %cst_93 {dimension_numbers = #tpu.dot_dimension_numbers<[1], [0], [0], [1], [0, 0, 1, 1], [], []>} : vector<64x4xbf16>, vector<4x4xbf16>, vector<64x4xf32> -> vector<64x4xf32>
    %164 = arith.addf %158, %163 : vector<64x4xf32>
    %c0_94 = arith.constant 0 : index
    %c32 = arith.constant 32 : index
    %c0_95 = arith.constant 0 : index
    %165 = vector.load %arg10[%c0_94, %c32, %c0_95] : memref<3x96x4xbf16, #tpu.memory_space<vmem>>, vector<1x64x4xbf16>
    %166 = vector.shape_cast %165 : vector<1x64x4xbf16> to vector<64x4xbf16>
    %c6 = arith.constant 6 : index
    %c0_96 = arith.constant 0 : index
    %c0_97 = arith.constant 0 : index
    %167 = vector.load %arg6[%c6, %c0_96, %c0_97] : memref<9x4x4xbf16, #tpu.memory_space<vmem>>, vector<1x4x4xbf16>
    %168 = vector.shape_cast %167 : vector<1x4x4xbf16> to vector<4x4xbf16>
    %cst_98 = arith.constant dense<0.000000e+00> : vector<64x4xf32>
    %169 = tpu.matmul %166, %168, %cst_98 {dimension_numbers = #tpu.dot_dimension_numbers<[1], [0], [0], [1], [0, 0, 1, 1], [], []>} : vector<64x4xbf16>, vector<4x4xbf16>, vector<64x4xf32> -> vector<64x4xf32>
    %170 = arith.addf %164, %169 : vector<64x4xf32>
    %c1_99 = arith.constant 1 : index
    %c32_100 = arith.constant 32 : index
    %c0_101 = arith.constant 0 : index
    %171 = vector.load %arg10[%c1_99, %c32_100, %c0_101] : memref<3x96x4xbf16, #tpu.memory_space<vmem>>, vector<1x64x4xbf16>
    %172 = vector.shape_cast %171 : vector<1x64x4xbf16> to vector<64x4xbf16>
    %c7 = arith.constant 7 : index
    %c0_102 = arith.constant 0 : index
    %c0_103 = arith.constant 0 : index
    %173 = vector.load %arg6[%c7, %c0_102, %c0_103] : memref<9x4x4xbf16, #tpu.memory_space<vmem>>, vector<1x4x4xbf16>
    %174 = vector.shape_cast %173 : vector<1x4x4xbf16> to vector<4x4xbf16>
    %cst_104 = arith.constant dense<0.000000e+00> : vector<64x4xf32>
    %175 = tpu.matmul %172, %174, %cst_104 {dimension_numbers = #tpu.dot_dimension_numbers<[1], [0], [0], [1], [0, 0, 1, 1], [], []>} : vector<64x4xbf16>, vector<4x4xbf16>, vector<64x4xf32> -> vector<64x4xf32>
    %176 = arith.addf %170, %175 : vector<64x4xf32>
    %c2_105 = arith.constant 2 : index
    %c32_106 = arith.constant 32 : index
    %c0_107 = arith.constant 0 : index
    %177 = vector.load %arg10[%c2_105, %c32_106, %c0_107] : memref<3x96x4xbf16, #tpu.memory_space<vmem>>, vector<1x64x4xbf16>
    %178 = vector.shape_cast %177 : vector<1x64x4xbf16> to vector<64x4xbf16>
    %c8 = arith.constant 8 : index
    %c0_108 = arith.constant 0 : index
    %c0_109 = arith.constant 0 : index
    %179 = vector.load %arg6[%c8, %c0_108, %c0_109] : memref<9x4x4xbf16, #tpu.memory_space<vmem>>, vector<1x4x4xbf16>
    %180 = vector.shape_cast %179 : vector<1x4x4xbf16> to vector<4x4xbf16>
    %cst_110 = arith.constant dense<0.000000e+00> : vector<64x4xf32>
    %181 = tpu.matmul %178, %180, %cst_110 {dimension_numbers = #tpu.dot_dimension_numbers<[1], [0], [0], [1], [0, 0, 1, 1], [], []>} : vector<64x4xbf16>, vector<4x4xbf16>, vector<64x4xf32> -> vector<64x4xf32>
    %182 = arith.addf %176, %181 : vector<64x4xf32>
    %c0_111 = arith.constant 0 : index
    %c0_112 = arith.constant 0 : index
    %183 = vector.load %arg7[%c0_111, %c0_112] : memref<1x4xf32, #tpu.memory_space<vmem>>, vector<1x4xf32>
    %184 = vector.broadcast %183 : vector<1x4xf32> to vector<64x4xf32>
    %185 = arith.addf %182, %184 : vector<64x4xf32>
    %186 = arith.truncf %185 : vector<64x4xf32> to vector<64x4xbf16>
    %c0_113 = arith.constant 0 : index
    %c0_114 = arith.constant 0 : index
    %187 = vector.load %arg8[%c0_113, %c0_114] : memref<64x4xbf16, #tpu.memory_space<vmem>>, vector<64x4xbf16>
    tpu.vector_store %arg8[%c0_113, %c0_114], %186 {strides = array<i32>} : memref<64x4xbf16, #tpu.memory_space<vmem>>, vector<64x4xbf16>,
    %cst_115 = arith.constant dense<0.000000e+00> : vector<4xf32>
    %188 = vector.multi_reduction <add>, %185, %cst_115 [0] : vector<64x4xf32> to vector<4xf32>
    %189 = vector.shape_cast %188 : vector<4xf32> to vector<1x4xf32>
    %190 = arith.mulf %185, %185 : vector<64x4xf32>
    %cst_116 = arith.constant dense<0.000000e+00> : vector<4xf32>
    %191 = vector.multi_reduction <add>, %190, %cst_116 [0] : vector<64x4xf32> to vector<4xf32>
    %192 = vector.shape_cast %191 : vector<4xf32> to vector<1x4xf32>
    %193 = tpu.concatenate %189, %192 in 0 : vector<1x4xf32>, vector<1x4xf32> -> vector<2x4xf32>
    %194 = vector.shape_cast %193 : vector<2x4xf32> to vector<1x2x4xf32>
    %c0_117 = arith.constant 0 : index
    %c0_118 = arith.constant 0 : index
    %c0_119 = arith.constant 0 : index
    %195 = vector.load %arg9[%c0_117, %c0_118, %c0_119] : memref<1x2x4xf32, #tpu.memory_space<vmem>>, vector<1x2x4xf32>
    tpu.vector_store %arg9[%c0_117, %c0_118, %c0_119], %194 {strides = array<i32>} : memref<1x2x4xf32, #tpu.memory_space<vmem>>, vector<1x2x4xf32>,
    return
  }
  func.func @transform_0(%arg0: i32) -> (i32, i32) {
    %c4_i32 = arith.constant 4 : i32
    %0 = arith.muli %arg0, %c4_i32 : i32
    %c1_i32 = arith.constant 1 : i32
    %1 = arith.subi %0, %c1_i32 : i32
    %c0_i32 = arith.constant 0 : i32
    %2 = arith.maxsi %1, %c0_i32 : i32
    %c0_i32_0 = arith.constant 0 : i32
    %c0_i32_1 = arith.constant 0 : i32
    return %2, %c0_i32_0 : i32, i32
  }
  func.func @transform_1(%arg0: i32) -> (i32, i32) {
    %c0_i32 = arith.constant 0 : i32
    %c0_i32_0 = arith.constant 0 : i32
    return %arg0, %c0_i32 : i32, i32
  }
  func.func @transform_2(%arg0: i32) -> (i32, i32) {
    %c1_i32 = arith.constant 1 : i32
    %0 = arith.addi %arg0, %c1_i32 : i32
    %c4_i32 = arith.constant 4 : i32
    %1 = arith.muli %0, %c4_i32 : i32
    %c31_i32 = arith.constant 31 : i32
    %2 = arith.minsi %1, %c31_i32 : i32
    %c0_i32 = arith.constant 0 : i32
    %c0_i32_0 = arith.constant 0 : i32
    return %2, %c0_i32 : i32, i32
  }
  func.func @transform_3(%arg0: i32) -> (i32, i32) {
    %c0_i32 = arith.constant 0 : i32
    %c0_i32_0 = arith.constant 0 : i32
    %c0_i32_1 = arith.constant 0 : i32
    return %c0_i32, %c0_i32_0 : i32, i32
  }
  func.func @transform_4(%arg0: i32) -> (i32, i32) {
    %c0_i32 = arith.constant 0 : i32
    %c0_i32_0 = arith.constant 0 : i32
    %c0_i32_1 = arith.constant 0 : i32
    return %c0_i32, %c0_i32_0 : i32, i32
  }
  func.func @transform_5(%arg0: i32) -> (i32, i32, i32) {
    %c0_i32 = arith.constant 0 : i32
    %c0_i32_0 = arith.constant 0 : i32
    %c0_i32_1 = arith.constant 0 : i32
    %c0_i32_2 = arith.constant 0 : i32
    return %c0_i32, %c0_i32_0, %c0_i32_1 : i32, i32, i32
  }
  func.func @transform_6(%arg0: i32) -> (i32, i32) {
    %c0_i32 = arith.constant 0 : i32
    %c0_i32_0 = arith.constant 0 : i32
    %c0_i32_1 = arith.constant 0 : i32
    return %c0_i32, %c0_i32_0 : i32, i32
  }
  func.func @transform_7(%arg0: i32) -> (i32, i32) {
    %c0_i32 = arith.constant 0 : i32
    %c0_i32_0 = arith.constant 0 : i32
    return %arg0, %c0_i32 : i32, i32
  }
  func.func @transform_8(%arg0: i32) -> (i32, i32, i32) {
    %c0_i32 = arith.constant 0 : i32
    %c0_i32_0 = arith.constant 0 : i32
    %c0_i32_1 = arith.constant 0 : i32
    return %arg0, %c0_i32, %c0_i32_0 : i32, i32, i32
  }
}

module attributes {stable_mosaic.version = 11 : i64} {
  func.func @_conv_kernel(%arg0: i32, %arg1: memref<16x4xbf16, #tpu.memory_space<vmem>>, %arg2: memref<64x4xbf16, #tpu.memory_space<vmem>>, %arg3: memref<16x4xbf16, #tpu.memory_space<vmem>>, %arg4: memref<1x4xf32, #tpu.memory_space<vmem>>, %arg5: memref<1x4xf32, #tpu.memory_space<vmem>>, %arg6: memref<9x4x4xbf16, #tpu.memory_space<vmem>>, %arg7: memref<1x4xf32, #tpu.memory_space<vmem>>, %arg8: memref<64x4xbf16, #tpu.memory_space<vmem>>, %arg9: memref<1x2x4xf32, #tpu.memory_space<vmem>>, %arg10: memref<3x96x4xbf16, #tpu.memory_space<vmem>>) attributes {dimension_semantics = [#tpu.dimension_semantics<parallel>], iteration_bounds = array<i64: 8>, scalar_prefetch = 0 : i64, scratch_operands = 1 : i64, tpu.core_type = #tpu.core_type<tc>, window_params = [{transform_indices = @transform_0, window_bounds = array<i64: 16, 4>}, {transform_indices = @transform_1, window_bounds = array<i64: 64, 4>}, {transform_indices = @transform_2, window_bounds = array<i64: 16, 4>}, {pipeline_mode = #tpu.pipeline_mode<synchronous>, transform_indices = @transform_3, window_bounds = array<i64: 1, 4>}, {pipeline_mode = #tpu.pipeline_mode<synchronous>, transform_indices = @transform_4, window_bounds = array<i64: 1, 4>}, {pipeline_mode = #tpu.pipeline_mode<synchronous>, transform_indices = @transform_5, window_bounds = array<i64: 9, 4, 4>}, {pipeline_mode = #tpu.pipeline_mode<synchronous>, transform_indices = @transform_6, window_bounds = array<i64: 1, 4>}, {transform_indices = @transform_7, window_bounds = array<i64: 64, 4>}, {transform_indices = @transform_8, window_bounds = array<i64: 1, 2, 4>}]} {
    %c4_i32 = arith.constant 4 : i32
    %c0_i32 = arith.constant 0 : i32
    %0 = arith.cmpi eq, %c4_i32, %c0_i32 : i32
    %c1_i32 = arith.constant 1 : i32
    %1 = arith.select %0, %c1_i32, %c4_i32 : i32
    %2 = arith.remsi %arg0, %1 : i32
    %c0_i32_0 = arith.constant 0 : i32
    %3 = arith.cmpi ne, %2, %c0_i32_0 : i32
    %c0_i32_1 = arith.constant 0 : i32
    %4 = arith.cmpi slt, %2, %c0_i32_1 : i32
    %c0_i32_2 = arith.constant 0 : i32
    %5 = arith.cmpi slt, %1, %c0_i32_2 : i32
    %6 = arith.xori %4, %5 : i1
    %7 = arith.andi %6, %3 : i1
    %8 = arith.addi %2, %1 : i32
    %9 = arith.select %7, %8, %2 : i32
    %c0_i32_3 = arith.constant 0 : i32
    %10 = arith.cmpi eq, %9, %c0_i32_3 : i32
    %cst = arith.constant 0.000000e+00 : f32
    %cst_4 = arith.constant 1.000000e+00 : f32
    %11 = arith.select %10, %cst, %cst_4 : f32
    %c1_i32_5 = arith.constant 1 : i32
    %12 = arith.addi %arg0, %c1_i32_5 : i32
    %c4_i32_6 = arith.constant 4 : i32
    %c0_i32_7 = arith.constant 0 : i32
    %13 = arith.cmpi eq, %c4_i32_6, %c0_i32_7 : i32
    %c1_i32_8 = arith.constant 1 : i32
    %14 = arith.select %13, %c1_i32_8, %c4_i32_6 : i32
    %15 = arith.remsi %12, %14 : i32
    %c0_i32_9 = arith.constant 0 : i32
    %16 = arith.cmpi ne, %15, %c0_i32_9 : i32
    %c0_i32_10 = arith.constant 0 : i32
    %17 = arith.cmpi slt, %15, %c0_i32_10 : i32
    %c0_i32_11 = arith.constant 0 : i32
    %18 = arith.cmpi slt, %14, %c0_i32_11 : i32
    %19 = arith.xori %17, %18 : i1
    %20 = arith.andi %19, %16 : i1
    %21 = arith.addi %15, %14 : i32
    %22 = arith.select %20, %21, %15 : i32
    %c0_i32_12 = arith.constant 0 : i32
    %23 = arith.cmpi eq, %22, %c0_i32_12 : i32
    %cst_13 = arith.constant 0.000000e+00 : f32
    %cst_14 = arith.constant 1.000000e+00 : f32
    %24 = arith.select %23, %cst_13, %cst_14 : f32
    %c0 = arith.constant 0 : index
    %c0_15 = arith.constant 0 : index
    %25 = vector.load %arg1[%c0, %c0_15] : memref<16x4xbf16, #tpu.memory_space<vmem>>, vector<16x4xbf16>
    %26 = arith.extf %25 : vector<16x4xbf16> to vector<16x4xf32>
    %c0_16 = arith.constant 0 : index
    %c0_17 = arith.constant 0 : index
    %27 = vector.load %arg4[%c0_16, %c0_17] : memref<1x4xf32, #tpu.memory_space<vmem>>, vector<1x4xf32>
    %28 = vector.broadcast %27 : vector<1x4xf32> to vector<16x4xf32>
    %29 = arith.mulf %26, %28 : vector<16x4xf32>
    %c0_18 = arith.constant 0 : index
    %c0_19 = arith.constant 0 : index
    %30 = vector.load %arg5[%c0_18, %c0_19] : memref<1x4xf32, #tpu.memory_space<vmem>>, vector<1x4xf32>
    %31 = vector.broadcast %30 : vector<1x4xf32> to vector<16x4xf32>
    %32 = arith.addf %29, %31 : vector<16x4xf32>
    %33 = arith.negf %32 : vector<16x4xf32>
    %34 = math.exp %33 : vector<16x4xf32>
    %cst_20 = arith.constant 1.000000e+00 : f32
    %35 = vector.broadcast %cst_20 : f32 to vector<16x4xf32>
    %36 = arith.addf %35, %34 : vector<16x4xf32>
    %37 = arith.divf %35, %36 : vector<16x4xf32>
    %38 = arith.mulf %32, %37 : vector<16x4xf32>
    %39 = vector.broadcast %11 : f32 to vector<16x4xf32>
    %40 = arith.mulf %38, %39 : vector<16x4xf32>
    %41 = tpu.iota {dimensions = array<i32: 1>} : vector<1x16x1xi32>
    %42 = vector.shape_cast %41 : vector<1x16x1xi32> to vector<16x1xi32>
    %c0_i32_21 = arith.constant 0 : i32
    %43 = vector.broadcast %c0_i32_21 : i32 to vector<16x1xi32>
    %44 = arith.cmpi sgt, %42, %43 : vector<16x1xi32>
    %45 = vector.extract_strided_slice %40 {offsets = [15, 0], sizes = [1, 4], strides = [1, 1]} : vector<16x4xf32> to vector<1x4xf32>
    %46 = vector.extract_strided_slice %40 {offsets = [0, 0], sizes = [15, 4], strides = [1, 1]} : vector<16x4xf32> to vector<15x4xf32>
    %47 = tpu.concatenate %45, %46 in 0 : vector<1x4xf32>, vector<15x4xf32> -> vector<16x4xf32>
    %cst_22 = arith.constant 0.000000e+00 : f32
    %48 = vector.shape_cast %44 : vector<16x1xi1> to vector<16x1xi1>
    %49 = vector.broadcast %48 : vector<16x1xi1> to vector<16x4xi1>
    %50 = vector.broadcast %cst_22 : f32 to vector<16x4xf32>
    %51 = arith.select %49, %47, %50 : vector<16x4xi1>, vector<16x4xf32>
    %52 = arith.truncf %51 : vector<16x4xf32> to vector<16x4xbf16>
    %53 = arith.truncf %40 : vector<16x4xf32> to vector<16x4xbf16>
    %c15_i32 = arith.constant 15 : i32
    %54 = vector.broadcast %c15_i32 : i32 to vector<16x1xi32>
    %55 = arith.cmpi slt, %42, %54 : vector<16x1xi32>
    %56 = vector.extract_strided_slice %40 {offsets = [1, 0], sizes = [15, 4], strides = [1, 1]} : vector<16x4xf32> to vector<15x4xf32>
    %57 = vector.extract_strided_slice %40 {offsets = [0, 0], sizes = [1, 4], strides = [1, 1]} : vector<16x4xf32> to vector<1x4xf32>
    %58 = tpu.concatenate %56, %57 in 0 : vector<15x4xf32>, vector<1x4xf32> -> vector<16x4xf32>
    %cst_23 = arith.constant 0.000000e+00 : f32
    %59 = vector.shape_cast %55 : vector<16x1xi1> to vector<16x1xi1>
    %60 = vector.broadcast %59 : vector<16x1xi1> to vector<16x4xi1>
    %61 = vector.broadcast %cst_23 : f32 to vector<16x4xf32>
    %62 = arith.select %60, %58, %61 : vector<16x4xi1>, vector<16x4xf32>
    %63 = arith.truncf %62 : vector<16x4xf32> to vector<16x4xbf16>
    %c0_24 = arith.constant 0 : index
    %c0_25 = arith.constant 0 : index
    %c0_26 = arith.constant 0 : index
    %64 = vector.load %arg10[%c0_24, %c0_25, %c0_26] : memref<3x96x4xbf16, #tpu.memory_space<vmem>>, vector<1x16x4xbf16>
    %65 = vector.shape_cast %64 : vector<1x16x4xbf16> to vector<16x4xbf16>
    %66 = vector.shape_cast %52 : vector<16x4xbf16> to vector<1x16x4xbf16>
    tpu.vector_store %arg10[%c0_24, %c0_25, %c0_26], %66 {strides = array<i32>} : memref<3x96x4xbf16, #tpu.memory_space<vmem>>, vector<1x16x4xbf16>,
    %c1 = arith.constant 1 : index
    %c0_27 = arith.constant 0 : index
    %c0_28 = arith.constant 0 : index
    %67 = vector.load %arg10[%c1, %c0_27, %c0_28] : memref<3x96x4xbf16, #tpu.memory_space<vmem>>, vector<1x16x4xbf16>
    %68 = vector.shape_cast %67 : vector<1x16x4xbf16> to vector<16x4xbf16>
    %69 = vector.shape_cast %53 : vector<16x4xbf16> to vector<1x16x4xbf16>
    tpu.vector_store %arg10[%c1, %c0_27, %c0_28], %69 {strides = array<i32>} : memref<3x96x4xbf16, #tpu.memory_space<vmem>>, vector<1x16x4xbf16>,
    %c2 = arith.constant 2 : index
    %c0_29 = arith.constant 0 : index
    %c0_30 = arith.constant 0 : index
    %70 = vector.load %arg10[%c2, %c0_29, %c0_30] : memref<3x96x4xbf16, #tpu.memory_space<vmem>>, vector<1x16x4xbf16>
    %71 = vector.shape_cast %70 : vector<1x16x4xbf16> to vector<16x4xbf16>
    %72 = vector.shape_cast %63 : vector<16x4xbf16> to vector<1x16x4xbf16>
    tpu.vector_store %arg10[%c2, %c0_29, %c0_30], %72 {strides = array<i32>} : memref<3x96x4xbf16, #tpu.memory_space<vmem>>, vector<1x16x4xbf16>,
    %c0_31 = arith.constant 0 : index
    %c0_32 = arith.constant 0 : index
    %73 = vector.load %arg2[%c0_31, %c0_32] : memref<64x4xbf16, #tpu.memory_space<vmem>>, vector<64x4xbf16>
    %74 = arith.extf %73 : vector<64x4xbf16> to vector<64x4xf32>
    %c0_33 = arith.constant 0 : index
    %c0_34 = arith.constant 0 : index
    %75 = vector.load %arg4[%c0_33, %c0_34] : memref<1x4xf32, #tpu.memory_space<vmem>>, vector<1x4xf32>
    %76 = vector.broadcast %75 : vector<1x4xf32> to vector<64x4xf32>
    %77 = arith.mulf %74, %76 : vector<64x4xf32>
    %c0_35 = arith.constant 0 : index
    %c0_36 = arith.constant 0 : index
    %78 = vector.load %arg5[%c0_35, %c0_36] : memref<1x4xf32, #tpu.memory_space<vmem>>, vector<1x4xf32>
    %79 = vector.broadcast %78 : vector<1x4xf32> to vector<64x4xf32>
    %80 = arith.addf %77, %79 : vector<64x4xf32>
    %81 = arith.negf %80 : vector<64x4xf32>
    %82 = math.exp %81 : vector<64x4xf32>
    %cst_37 = arith.constant 1.000000e+00 : f32
    %83 = vector.broadcast %cst_37 : f32 to vector<64x4xf32>
    %84 = arith.addf %83, %82 : vector<64x4xf32>
    %85 = arith.divf %83, %84 : vector<64x4xf32>
    %86 = arith.mulf %80, %85 : vector<64x4xf32>
    %87 = tpu.iota {dimensions = array<i32: 1>} : vector<4x16x1xi32>
    %88 = vector.shape_cast %87 : vector<4x16x1xi32> to vector<64x1xi32>
    %c0_i32_38 = arith.constant 0 : i32
    %89 = vector.broadcast %c0_i32_38 : i32 to vector<64x1xi32>
    %90 = arith.cmpi sgt, %88, %89 : vector<64x1xi32>
    %91 = vector.extract_strided_slice %86 {offsets = [63, 0], sizes = [1, 4], strides = [1, 1]} : vector<64x4xf32> to vector<1x4xf32>
    %92 = vector.extract_strided_slice %86 {offsets = [0, 0], sizes = [63, 4], strides = [1, 1]} : vector<64x4xf32> to vector<63x4xf32>
    %93 = tpu.concatenate %91, %92 in 0 : vector<1x4xf32>, vector<63x4xf32> -> vector<64x4xf32>
    %cst_39 = arith.constant 0.000000e+00 : f32
    %94 = vector.shape_cast %90 : vector<64x1xi1> to vector<64x1xi1>
    %95 = vector.broadcast %94 : vector<64x1xi1> to vector<64x4xi1>
    %96 = vector.broadcast %cst_39 : f32 to vector<64x4xf32>
    %97 = arith.select %95, %93, %96 : vector<64x4xi1>, vector<64x4xf32>
    %98 = arith.truncf %97 : vector<64x4xf32> to vector<64x4xbf16>
    %99 = arith.truncf %86 : vector<64x4xf32> to vector<64x4xbf16>
    %c15_i32_40 = arith.constant 15 : i32
    %100 = vector.broadcast %c15_i32_40 : i32 to vector<64x1xi32>
    %101 = arith.cmpi slt, %88, %100 : vector<64x1xi32>
    %102 = vector.extract_strided_slice %86 {offsets = [1, 0], sizes = [63, 4], strides = [1, 1]} : vector<64x4xf32> to vector<63x4xf32>
    %103 = vector.extract_strided_slice %86 {offsets = [0, 0], sizes = [1, 4], strides = [1, 1]} : vector<64x4xf32> to vector<1x4xf32>
    %104 = tpu.concatenate %102, %103 in 0 : vector<63x4xf32>, vector<1x4xf32> -> vector<64x4xf32>
    %cst_41 = arith.constant 0.000000e+00 : f32
    %105 = vector.shape_cast %101 : vector<64x1xi1> to vector<64x1xi1>
    %106 = vector.broadcast %105 : vector<64x1xi1> to vector<64x4xi1>
    %107 = vector.broadcast %cst_41 : f32 to vector<64x4xf32>
    %108 = arith.select %106, %104, %107 : vector<64x4xi1>, vector<64x4xf32>
    %109 = arith.truncf %108 : vector<64x4xf32> to vector<64x4xbf16>
    %c0_42 = arith.constant 0 : index
    %c16 = arith.constant 16 : index
    %c0_43 = arith.constant 0 : index
    %110 = vector.load %arg10[%c0_42, %c16, %c0_43] : memref<3x96x4xbf16, #tpu.memory_space<vmem>>, vector<1x64x4xbf16>
    %111 = vector.shape_cast %110 : vector<1x64x4xbf16> to vector<64x4xbf16>
    %112 = vector.shape_cast %98 : vector<64x4xbf16> to vector<1x64x4xbf16>
    tpu.vector_store %arg10[%c0_42, %c16, %c0_43], %112 {strides = array<i32>} : memref<3x96x4xbf16, #tpu.memory_space<vmem>>, vector<1x64x4xbf16>,
    %c1_44 = arith.constant 1 : index
    %c16_45 = arith.constant 16 : index
    %c0_46 = arith.constant 0 : index
    %113 = vector.load %arg10[%c1_44, %c16_45, %c0_46] : memref<3x96x4xbf16, #tpu.memory_space<vmem>>, vector<1x64x4xbf16>
    %114 = vector.shape_cast %113 : vector<1x64x4xbf16> to vector<64x4xbf16>
    %115 = vector.shape_cast %99 : vector<64x4xbf16> to vector<1x64x4xbf16>
    tpu.vector_store %arg10[%c1_44, %c16_45, %c0_46], %115 {strides = array<i32>} : memref<3x96x4xbf16, #tpu.memory_space<vmem>>, vector<1x64x4xbf16>,
    %c2_47 = arith.constant 2 : index
    %c16_48 = arith.constant 16 : index
    %c0_49 = arith.constant 0 : index
    %116 = vector.load %arg10[%c2_47, %c16_48, %c0_49] : memref<3x96x4xbf16, #tpu.memory_space<vmem>>, vector<1x64x4xbf16>
    %117 = vector.shape_cast %116 : vector<1x64x4xbf16> to vector<64x4xbf16>
    %118 = vector.shape_cast %109 : vector<64x4xbf16> to vector<1x64x4xbf16>
    tpu.vector_store %arg10[%c2_47, %c16_48, %c0_49], %118 {strides = array<i32>} : memref<3x96x4xbf16, #tpu.memory_space<vmem>>, vector<1x64x4xbf16>,
    %c0_50 = arith.constant 0 : index
    %c0_51 = arith.constant 0 : index
    %119 = vector.load %arg3[%c0_50, %c0_51] : memref<16x4xbf16, #tpu.memory_space<vmem>>, vector<16x4xbf16>
    %120 = arith.extf %119 : vector<16x4xbf16> to vector<16x4xf32>
    %c0_52 = arith.constant 0 : index
    %c0_53 = arith.constant 0 : index
    %121 = vector.load %arg4[%c0_52, %c0_53] : memref<1x4xf32, #tpu.memory_space<vmem>>, vector<1x4xf32>
    %122 = vector.broadcast %121 : vector<1x4xf32> to vector<16x4xf32>
    %123 = arith.mulf %120, %122 : vector<16x4xf32>
    %c0_54 = arith.constant 0 : index
    %c0_55 = arith.constant 0 : index
    %124 = vector.load %arg5[%c0_54, %c0_55] : memref<1x4xf32, #tpu.memory_space<vmem>>, vector<1x4xf32>
    %125 = vector.broadcast %124 : vector<1x4xf32> to vector<16x4xf32>
    %126 = arith.addf %123, %125 : vector<16x4xf32>
    %127 = arith.negf %126 : vector<16x4xf32>
    %128 = math.exp %127 : vector<16x4xf32>
    %cst_56 = arith.constant 1.000000e+00 : f32
    %129 = vector.broadcast %cst_56 : f32 to vector<16x4xf32>
    %130 = arith.addf %129, %128 : vector<16x4xf32>
    %131 = arith.divf %129, %130 : vector<16x4xf32>
    %132 = arith.mulf %126, %131 : vector<16x4xf32>
    %133 = vector.broadcast %24 : f32 to vector<16x4xf32>
    %134 = arith.mulf %132, %133 : vector<16x4xf32>
    %135 = tpu.iota {dimensions = array<i32: 1>} : vector<1x16x1xi32>
    %136 = vector.shape_cast %135 : vector<1x16x1xi32> to vector<16x1xi32>
    %c0_i32_57 = arith.constant 0 : i32
    %137 = vector.broadcast %c0_i32_57 : i32 to vector<16x1xi32>
    %138 = arith.cmpi sgt, %136, %137 : vector<16x1xi32>
    %139 = vector.extract_strided_slice %134 {offsets = [15, 0], sizes = [1, 4], strides = [1, 1]} : vector<16x4xf32> to vector<1x4xf32>
    %140 = vector.extract_strided_slice %134 {offsets = [0, 0], sizes = [15, 4], strides = [1, 1]} : vector<16x4xf32> to vector<15x4xf32>
    %141 = tpu.concatenate %139, %140 in 0 : vector<1x4xf32>, vector<15x4xf32> -> vector<16x4xf32>
    %cst_58 = arith.constant 0.000000e+00 : f32
    %142 = vector.shape_cast %138 : vector<16x1xi1> to vector<16x1xi1>
    %143 = vector.broadcast %142 : vector<16x1xi1> to vector<16x4xi1>
    %144 = vector.broadcast %cst_58 : f32 to vector<16x4xf32>
    %145 = arith.select %143, %141, %144 : vector<16x4xi1>, vector<16x4xf32>
    %146 = arith.truncf %145 : vector<16x4xf32> to vector<16x4xbf16>
    %147 = arith.truncf %134 : vector<16x4xf32> to vector<16x4xbf16>
    %c15_i32_59 = arith.constant 15 : i32
    %148 = vector.broadcast %c15_i32_59 : i32 to vector<16x1xi32>
    %149 = arith.cmpi slt, %136, %148 : vector<16x1xi32>
    %150 = vector.extract_strided_slice %134 {offsets = [1, 0], sizes = [15, 4], strides = [1, 1]} : vector<16x4xf32> to vector<15x4xf32>
    %151 = vector.extract_strided_slice %134 {offsets = [0, 0], sizes = [1, 4], strides = [1, 1]} : vector<16x4xf32> to vector<1x4xf32>
    %152 = tpu.concatenate %150, %151 in 0 : vector<15x4xf32>, vector<1x4xf32> -> vector<16x4xf32>
    %cst_60 = arith.constant 0.000000e+00 : f32
    %153 = vector.shape_cast %149 : vector<16x1xi1> to vector<16x1xi1>
    %154 = vector.broadcast %153 : vector<16x1xi1> to vector<16x4xi1>
    %155 = vector.broadcast %cst_60 : f32 to vector<16x4xf32>
    %156 = arith.select %154, %152, %155 : vector<16x4xi1>, vector<16x4xf32>
    %157 = arith.truncf %156 : vector<16x4xf32> to vector<16x4xbf16>
    %c0_61 = arith.constant 0 : index
    %c80 = arith.constant 80 : index
    %c0_62 = arith.constant 0 : index
    %158 = vector.load %arg10[%c0_61, %c80, %c0_62] : memref<3x96x4xbf16, #tpu.memory_space<vmem>>, vector<1x16x4xbf16>
    %159 = vector.shape_cast %158 : vector<1x16x4xbf16> to vector<16x4xbf16>
    %160 = vector.shape_cast %146 : vector<16x4xbf16> to vector<1x16x4xbf16>
    tpu.vector_store %arg10[%c0_61, %c80, %c0_62], %160 {strides = array<i32>} : memref<3x96x4xbf16, #tpu.memory_space<vmem>>, vector<1x16x4xbf16>,
    %c1_63 = arith.constant 1 : index
    %c80_64 = arith.constant 80 : index
    %c0_65 = arith.constant 0 : index
    %161 = vector.load %arg10[%c1_63, %c80_64, %c0_65] : memref<3x96x4xbf16, #tpu.memory_space<vmem>>, vector<1x16x4xbf16>
    %162 = vector.shape_cast %161 : vector<1x16x4xbf16> to vector<16x4xbf16>
    %163 = vector.shape_cast %147 : vector<16x4xbf16> to vector<1x16x4xbf16>
    tpu.vector_store %arg10[%c1_63, %c80_64, %c0_65], %163 {strides = array<i32>} : memref<3x96x4xbf16, #tpu.memory_space<vmem>>, vector<1x16x4xbf16>,
    %c2_66 = arith.constant 2 : index
    %c80_67 = arith.constant 80 : index
    %c0_68 = arith.constant 0 : index
    %164 = vector.load %arg10[%c2_66, %c80_67, %c0_68] : memref<3x96x4xbf16, #tpu.memory_space<vmem>>, vector<1x16x4xbf16>
    %165 = vector.shape_cast %164 : vector<1x16x4xbf16> to vector<16x4xbf16>
    %166 = vector.shape_cast %157 : vector<16x4xbf16> to vector<1x16x4xbf16>
    tpu.vector_store %arg10[%c2_66, %c80_67, %c0_68], %166 {strides = array<i32>} : memref<3x96x4xbf16, #tpu.memory_space<vmem>>, vector<1x16x4xbf16>,
    %cst_69 = arith.constant 0.000000e+00 : f32
    %167 = vector.broadcast %cst_69 : f32 to vector<64x4xf32>
    %c0_70 = arith.constant 0 : index
    %c0_71 = arith.constant 0 : index
    %c0_72 = arith.constant 0 : index
    %168 = vector.load %arg10[%c0_70, %c0_71, %c0_72] : memref<3x96x4xbf16, #tpu.memory_space<vmem>>, vector<1x64x4xbf16>
    %169 = vector.shape_cast %168 : vector<1x64x4xbf16> to vector<64x4xbf16>
    %c0_73 = arith.constant 0 : index
    %c0_74 = arith.constant 0 : index
    %c0_75 = arith.constant 0 : index
    %170 = vector.load %arg6[%c0_73, %c0_74, %c0_75] : memref<9x4x4xbf16, #tpu.memory_space<vmem>>, vector<1x4x4xbf16>
    %171 = vector.shape_cast %170 : vector<1x4x4xbf16> to vector<4x4xbf16>
    %cst_76 = arith.constant dense<0.000000e+00> : vector<64x4xf32>
    %172 = tpu.matmul %169, %171, %cst_76 {dimension_numbers = #tpu.dot_dimension_numbers<[1], [0], [0], [1], [0, 0, 1, 1], [], []>} : vector<64x4xbf16>, vector<4x4xbf16>, vector<64x4xf32> -> vector<64x4xf32>
    %173 = arith.addf %167, %172 : vector<64x4xf32>
    %c1_77 = arith.constant 1 : index
    %c0_78 = arith.constant 0 : index
    %c0_79 = arith.constant 0 : index
    %174 = vector.load %arg10[%c1_77, %c0_78, %c0_79] : memref<3x96x4xbf16, #tpu.memory_space<vmem>>, vector<1x64x4xbf16>
    %175 = vector.shape_cast %174 : vector<1x64x4xbf16> to vector<64x4xbf16>
    %c1_80 = arith.constant 1 : index
    %c0_81 = arith.constant 0 : index
    %c0_82 = arith.constant 0 : index
    %176 = vector.load %arg6[%c1_80, %c0_81, %c0_82] : memref<9x4x4xbf16, #tpu.memory_space<vmem>>, vector<1x4x4xbf16>
    %177 = vector.shape_cast %176 : vector<1x4x4xbf16> to vector<4x4xbf16>
    %cst_83 = arith.constant dense<0.000000e+00> : vector<64x4xf32>
    %178 = tpu.matmul %175, %177, %cst_83 {dimension_numbers = #tpu.dot_dimension_numbers<[1], [0], [0], [1], [0, 0, 1, 1], [], []>} : vector<64x4xbf16>, vector<4x4xbf16>, vector<64x4xf32> -> vector<64x4xf32>
    %179 = arith.addf %173, %178 : vector<64x4xf32>
    %c2_84 = arith.constant 2 : index
    %c0_85 = arith.constant 0 : index
    %c0_86 = arith.constant 0 : index
    %180 = vector.load %arg10[%c2_84, %c0_85, %c0_86] : memref<3x96x4xbf16, #tpu.memory_space<vmem>>, vector<1x64x4xbf16>
    %181 = vector.shape_cast %180 : vector<1x64x4xbf16> to vector<64x4xbf16>
    %c2_87 = arith.constant 2 : index
    %c0_88 = arith.constant 0 : index
    %c0_89 = arith.constant 0 : index
    %182 = vector.load %arg6[%c2_87, %c0_88, %c0_89] : memref<9x4x4xbf16, #tpu.memory_space<vmem>>, vector<1x4x4xbf16>
    %183 = vector.shape_cast %182 : vector<1x4x4xbf16> to vector<4x4xbf16>
    %cst_90 = arith.constant dense<0.000000e+00> : vector<64x4xf32>
    %184 = tpu.matmul %181, %183, %cst_90 {dimension_numbers = #tpu.dot_dimension_numbers<[1], [0], [0], [1], [0, 0, 1, 1], [], []>} : vector<64x4xbf16>, vector<4x4xbf16>, vector<64x4xf32> -> vector<64x4xf32>
    %185 = arith.addf %179, %184 : vector<64x4xf32>
    %c0_91 = arith.constant 0 : index
    %c16_92 = arith.constant 16 : index
    %c0_93 = arith.constant 0 : index
    %186 = vector.load %arg10[%c0_91, %c16_92, %c0_93] : memref<3x96x4xbf16, #tpu.memory_space<vmem>>, vector<1x64x4xbf16>
    %187 = vector.shape_cast %186 : vector<1x64x4xbf16> to vector<64x4xbf16>
    %c3 = arith.constant 3 : index
    %c0_94 = arith.constant 0 : index
    %c0_95 = arith.constant 0 : index
    %188 = vector.load %arg6[%c3, %c0_94, %c0_95] : memref<9x4x4xbf16, #tpu.memory_space<vmem>>, vector<1x4x4xbf16>
    %189 = vector.shape_cast %188 : vector<1x4x4xbf16> to vector<4x4xbf16>
    %cst_96 = arith.constant dense<0.000000e+00> : vector<64x4xf32>
    %190 = tpu.matmul %187, %189, %cst_96 {dimension_numbers = #tpu.dot_dimension_numbers<[1], [0], [0], [1], [0, 0, 1, 1], [], []>} : vector<64x4xbf16>, vector<4x4xbf16>, vector<64x4xf32> -> vector<64x4xf32>
    %191 = arith.addf %185, %190 : vector<64x4xf32>
    %c1_97 = arith.constant 1 : index
    %c16_98 = arith.constant 16 : index
    %c0_99 = arith.constant 0 : index
    %192 = vector.load %arg10[%c1_97, %c16_98, %c0_99] : memref<3x96x4xbf16, #tpu.memory_space<vmem>>, vector<1x64x4xbf16>
    %193 = vector.shape_cast %192 : vector<1x64x4xbf16> to vector<64x4xbf16>
    %c4 = arith.constant 4 : index
    %c0_100 = arith.constant 0 : index
    %c0_101 = arith.constant 0 : index
    %194 = vector.load %arg6[%c4, %c0_100, %c0_101] : memref<9x4x4xbf16, #tpu.memory_space<vmem>>, vector<1x4x4xbf16>
    %195 = vector.shape_cast %194 : vector<1x4x4xbf16> to vector<4x4xbf16>
    %cst_102 = arith.constant dense<0.000000e+00> : vector<64x4xf32>
    %196 = tpu.matmul %193, %195, %cst_102 {dimension_numbers = #tpu.dot_dimension_numbers<[1], [0], [0], [1], [0, 0, 1, 1], [], []>} : vector<64x4xbf16>, vector<4x4xbf16>, vector<64x4xf32> -> vector<64x4xf32>
    %197 = arith.addf %191, %196 : vector<64x4xf32>
    %c2_103 = arith.constant 2 : index
    %c16_104 = arith.constant 16 : index
    %c0_105 = arith.constant 0 : index
    %198 = vector.load %arg10[%c2_103, %c16_104, %c0_105] : memref<3x96x4xbf16, #tpu.memory_space<vmem>>, vector<1x64x4xbf16>
    %199 = vector.shape_cast %198 : vector<1x64x4xbf16> to vector<64x4xbf16>
    %c5 = arith.constant 5 : index
    %c0_106 = arith.constant 0 : index
    %c0_107 = arith.constant 0 : index
    %200 = vector.load %arg6[%c5, %c0_106, %c0_107] : memref<9x4x4xbf16, #tpu.memory_space<vmem>>, vector<1x4x4xbf16>
    %201 = vector.shape_cast %200 : vector<1x4x4xbf16> to vector<4x4xbf16>
    %cst_108 = arith.constant dense<0.000000e+00> : vector<64x4xf32>
    %202 = tpu.matmul %199, %201, %cst_108 {dimension_numbers = #tpu.dot_dimension_numbers<[1], [0], [0], [1], [0, 0, 1, 1], [], []>} : vector<64x4xbf16>, vector<4x4xbf16>, vector<64x4xf32> -> vector<64x4xf32>
    %203 = arith.addf %197, %202 : vector<64x4xf32>
    %c0_109 = arith.constant 0 : index
    %c32 = arith.constant 32 : index
    %c0_110 = arith.constant 0 : index
    %204 = vector.load %arg10[%c0_109, %c32, %c0_110] : memref<3x96x4xbf16, #tpu.memory_space<vmem>>, vector<1x64x4xbf16>
    %205 = vector.shape_cast %204 : vector<1x64x4xbf16> to vector<64x4xbf16>
    %c6 = arith.constant 6 : index
    %c0_111 = arith.constant 0 : index
    %c0_112 = arith.constant 0 : index
    %206 = vector.load %arg6[%c6, %c0_111, %c0_112] : memref<9x4x4xbf16, #tpu.memory_space<vmem>>, vector<1x4x4xbf16>
    %207 = vector.shape_cast %206 : vector<1x4x4xbf16> to vector<4x4xbf16>
    %cst_113 = arith.constant dense<0.000000e+00> : vector<64x4xf32>
    %208 = tpu.matmul %205, %207, %cst_113 {dimension_numbers = #tpu.dot_dimension_numbers<[1], [0], [0], [1], [0, 0, 1, 1], [], []>} : vector<64x4xbf16>, vector<4x4xbf16>, vector<64x4xf32> -> vector<64x4xf32>
    %209 = arith.addf %203, %208 : vector<64x4xf32>
    %c1_114 = arith.constant 1 : index
    %c32_115 = arith.constant 32 : index
    %c0_116 = arith.constant 0 : index
    %210 = vector.load %arg10[%c1_114, %c32_115, %c0_116] : memref<3x96x4xbf16, #tpu.memory_space<vmem>>, vector<1x64x4xbf16>
    %211 = vector.shape_cast %210 : vector<1x64x4xbf16> to vector<64x4xbf16>
    %c7 = arith.constant 7 : index
    %c0_117 = arith.constant 0 : index
    %c0_118 = arith.constant 0 : index
    %212 = vector.load %arg6[%c7, %c0_117, %c0_118] : memref<9x4x4xbf16, #tpu.memory_space<vmem>>, vector<1x4x4xbf16>
    %213 = vector.shape_cast %212 : vector<1x4x4xbf16> to vector<4x4xbf16>
    %cst_119 = arith.constant dense<0.000000e+00> : vector<64x4xf32>
    %214 = tpu.matmul %211, %213, %cst_119 {dimension_numbers = #tpu.dot_dimension_numbers<[1], [0], [0], [1], [0, 0, 1, 1], [], []>} : vector<64x4xbf16>, vector<4x4xbf16>, vector<64x4xf32> -> vector<64x4xf32>
    %215 = arith.addf %209, %214 : vector<64x4xf32>
    %c2_120 = arith.constant 2 : index
    %c32_121 = arith.constant 32 : index
    %c0_122 = arith.constant 0 : index
    %216 = vector.load %arg10[%c2_120, %c32_121, %c0_122] : memref<3x96x4xbf16, #tpu.memory_space<vmem>>, vector<1x64x4xbf16>
    %217 = vector.shape_cast %216 : vector<1x64x4xbf16> to vector<64x4xbf16>
    %c8 = arith.constant 8 : index
    %c0_123 = arith.constant 0 : index
    %c0_124 = arith.constant 0 : index
    %218 = vector.load %arg6[%c8, %c0_123, %c0_124] : memref<9x4x4xbf16, #tpu.memory_space<vmem>>, vector<1x4x4xbf16>
    %219 = vector.shape_cast %218 : vector<1x4x4xbf16> to vector<4x4xbf16>
    %cst_125 = arith.constant dense<0.000000e+00> : vector<64x4xf32>
    %220 = tpu.matmul %217, %219, %cst_125 {dimension_numbers = #tpu.dot_dimension_numbers<[1], [0], [0], [1], [0, 0, 1, 1], [], []>} : vector<64x4xbf16>, vector<4x4xbf16>, vector<64x4xf32> -> vector<64x4xf32>
    %221 = arith.addf %215, %220 : vector<64x4xf32>
    %c0_126 = arith.constant 0 : index
    %c0_127 = arith.constant 0 : index
    %222 = vector.load %arg7[%c0_126, %c0_127] : memref<1x4xf32, #tpu.memory_space<vmem>>, vector<1x4xf32>
    %223 = vector.broadcast %222 : vector<1x4xf32> to vector<64x4xf32>
    %224 = arith.addf %221, %223 : vector<64x4xf32>
    %225 = arith.truncf %224 : vector<64x4xf32> to vector<64x4xbf16>
    %c0_128 = arith.constant 0 : index
    %c0_129 = arith.constant 0 : index
    %226 = vector.load %arg8[%c0_128, %c0_129] : memref<64x4xbf16, #tpu.memory_space<vmem>>, vector<64x4xbf16>
    tpu.vector_store %arg8[%c0_128, %c0_129], %225 {strides = array<i32>} : memref<64x4xbf16, #tpu.memory_space<vmem>>, vector<64x4xbf16>,
    %cst_130 = arith.constant dense<0.000000e+00> : vector<4xf32>
    %227 = vector.multi_reduction <add>, %224, %cst_130 [0] : vector<64x4xf32> to vector<4xf32>
    %228 = vector.shape_cast %227 : vector<4xf32> to vector<1x4xf32>
    %229 = arith.mulf %224, %224 : vector<64x4xf32>
    %cst_131 = arith.constant dense<0.000000e+00> : vector<4xf32>
    %230 = vector.multi_reduction <add>, %229, %cst_131 [0] : vector<64x4xf32> to vector<4xf32>
    %231 = vector.shape_cast %230 : vector<4xf32> to vector<1x4xf32>
    %232 = tpu.concatenate %228, %231 in 0 : vector<1x4xf32>, vector<1x4xf32> -> vector<2x4xf32>
    %233 = vector.shape_cast %232 : vector<2x4xf32> to vector<1x2x4xf32>
    %c0_132 = arith.constant 0 : index
    %c0_133 = arith.constant 0 : index
    %c0_134 = arith.constant 0 : index
    %234 = vector.load %arg9[%c0_132, %c0_133, %c0_134] : memref<1x2x4xf32, #tpu.memory_space<vmem>>, vector<1x2x4xf32>
    tpu.vector_store %arg9[%c0_132, %c0_133, %c0_134], %233 {strides = array<i32>} : memref<1x2x4xf32, #tpu.memory_space<vmem>>, vector<1x2x4xf32>,
    return
  }
  func.func @transform_0(%arg0: i32) -> (i32, i32) {
    %c4_i32 = arith.constant 4 : i32
    %0 = arith.muli %arg0, %c4_i32 : i32
    %c1_i32 = arith.constant 1 : i32
    %1 = arith.subi %0, %c1_i32 : i32
    %c0_i32 = arith.constant 0 : i32
    %2 = arith.maxsi %1, %c0_i32 : i32
    %c0_i32_0 = arith.constant 0 : i32
    %c0_i32_1 = arith.constant 0 : i32
    return %2, %c0_i32_0 : i32, i32
  }
  func.func @transform_1(%arg0: i32) -> (i32, i32) {
    %c0_i32 = arith.constant 0 : i32
    %c0_i32_0 = arith.constant 0 : i32
    return %arg0, %c0_i32 : i32, i32
  }
  func.func @transform_2(%arg0: i32) -> (i32, i32) {
    %c1_i32 = arith.constant 1 : i32
    %0 = arith.addi %arg0, %c1_i32 : i32
    %c4_i32 = arith.constant 4 : i32
    %1 = arith.muli %0, %c4_i32 : i32
    %c31_i32 = arith.constant 31 : i32
    %2 = arith.minsi %1, %c31_i32 : i32
    %c0_i32 = arith.constant 0 : i32
    %c0_i32_0 = arith.constant 0 : i32
    return %2, %c0_i32 : i32, i32
  }
  func.func @transform_3(%arg0: i32) -> (i32, i32) {
    %c0_i32 = arith.constant 0 : i32
    %c0_i32_0 = arith.constant 0 : i32
    %c0_i32_1 = arith.constant 0 : i32
    return %c0_i32, %c0_i32_0 : i32, i32
  }
  func.func @transform_4(%arg0: i32) -> (i32, i32) {
    %c0_i32 = arith.constant 0 : i32
    %c0_i32_0 = arith.constant 0 : i32
    %c0_i32_1 = arith.constant 0 : i32
    return %c0_i32, %c0_i32_0 : i32, i32
  }
  func.func @transform_5(%arg0: i32) -> (i32, i32, i32) {
    %c0_i32 = arith.constant 0 : i32
    %c0_i32_0 = arith.constant 0 : i32
    %c0_i32_1 = arith.constant 0 : i32
    %c0_i32_2 = arith.constant 0 : i32
    return %c0_i32, %c0_i32_0, %c0_i32_1 : i32, i32, i32
  }
  func.func @transform_6(%arg0: i32) -> (i32, i32) {
    %c0_i32 = arith.constant 0 : i32
    %c0_i32_0 = arith.constant 0 : i32
    %c0_i32_1 = arith.constant 0 : i32
    return %c0_i32, %c0_i32_0 : i32, i32
  }
  func.func @transform_7(%arg0: i32) -> (i32, i32) {
    %c0_i32 = arith.constant 0 : i32
    %c0_i32_0 = arith.constant 0 : i32
    return %arg0, %c0_i32 : i32, i32
  }
  func.func @transform_8(%arg0: i32) -> (i32, i32, i32) {
    %c0_i32 = arith.constant 0 : i32
    %c0_i32_0 = arith.constant 0 : i32
    %c0_i32_1 = arith.constant 0 : i32
    return %arg0, %c0_i32, %c0_i32_0 : i32, i32, i32
  }
}

module attributes {stable_mosaic.version = 11 : i64} {
  func.func @_finalize_kernel(%arg0: i32, %arg1: memref<16x128xbf16, #tpu.memory_space<vmem>>, %arg2: memref<16x128xf32, #tpu.memory_space<vmem>>, %arg3: memref<1x128xf32, #tpu.memory_space<vmem>>, %arg4: memref<1x128xf32, #tpu.memory_space<vmem>>, %arg5: memref<16x128xf32, #tpu.memory_space<vmem>>) attributes {dimension_semantics = [#tpu.dimension_semantics<parallel>], iteration_bounds = array<i64: 1>, scalar_prefetch = 0 : i64, scratch_operands = 0 : i64, tpu.core_type = #tpu.core_type<tc>, window_params = [{transform_indices = @transform_0, window_bounds = array<i64: 16, 128>}, {transform_indices = @transform_1, window_bounds = array<i64: 16, 128>}, {pipeline_mode = #tpu.pipeline_mode<synchronous>, transform_indices = @transform_2, window_bounds = array<i64: 1, 128>}, {pipeline_mode = #tpu.pipeline_mode<synchronous>, transform_indices = @transform_3, window_bounds = array<i64: 1, 128>}, {transform_indices = @transform_4, window_bounds = array<i64: 16, 128>}]} {
    %c0 = arith.constant 0 : index
    %c0_0 = arith.constant 0 : index
    %0 = vector.load %arg1[%c0, %c0_0] : memref<16x128xbf16, #tpu.memory_space<vmem>>, vector<16x128xbf16>
    %1 = arith.extf %0 : vector<16x128xbf16> to vector<16x128xf32>
    %c0_1 = arith.constant 0 : index
    %c0_2 = arith.constant 0 : index
    %2 = vector.load %arg3[%c0_1, %c0_2] : memref<1x128xf32, #tpu.memory_space<vmem>>, vector<1x128xf32>
    %3 = vector.broadcast %2 : vector<1x128xf32> to vector<16x128xf32>
    %4 = arith.mulf %1, %3 : vector<16x128xf32>
    %c0_3 = arith.constant 0 : index
    %c0_4 = arith.constant 0 : index
    %5 = vector.load %arg4[%c0_3, %c0_4] : memref<1x128xf32, #tpu.memory_space<vmem>>, vector<1x128xf32>
    %6 = vector.broadcast %5 : vector<1x128xf32> to vector<16x128xf32>
    %7 = arith.addf %4, %6 : vector<16x128xf32>
    %c0_5 = arith.constant 0 : index
    %c0_6 = arith.constant 0 : index
    %8 = vector.load %arg2[%c0_5, %c0_6] : memref<16x128xf32, #tpu.memory_space<vmem>>, vector<16x128xf32>
    %9 = arith.addf %7, %8 : vector<16x128xf32>
    %10 = arith.negf %9 : vector<16x128xf32>
    %11 = math.exp %10 : vector<16x128xf32>
    %cst = arith.constant 1.000000e+00 : f32
    %12 = vector.broadcast %cst : f32 to vector<16x128xf32>
    %13 = arith.addf %12, %11 : vector<16x128xf32>
    %14 = arith.divf %12, %13 : vector<16x128xf32>
    %15 = arith.mulf %9, %14 : vector<16x128xf32>
    %c0_7 = arith.constant 0 : index
    %c0_8 = arith.constant 0 : index
    %16 = vector.load %arg5[%c0_7, %c0_8] : memref<16x128xf32, #tpu.memory_space<vmem>>, vector<16x128xf32>
    tpu.vector_store %arg5[%c0_7, %c0_8], %15 {strides = array<i32>} : memref<16x128xf32, #tpu.memory_space<vmem>>, vector<16x128xf32>,
    return
  }
  func.func @transform_0(%arg0: i32) -> (i32, i32) {
    %c0_i32 = arith.constant 0 : i32
    %c0_i32_0 = arith.constant 0 : i32
    return %arg0, %c0_i32 : i32, i32
  }
  func.func @transform_1(%arg0: i32) -> (i32, i32) {
    %c0_i32 = arith.constant 0 : i32
    %c0_i32_0 = arith.constant 0 : i32
    return %arg0, %c0_i32 : i32, i32
  }
  func.func @transform_2(%arg0: i32) -> (i32, i32) {
    %c0_i32 = arith.constant 0 : i32
    %c0_i32_0 = arith.constant 0 : i32
    %c0_i32_1 = arith.constant 0 : i32
    return %c0_i32, %c0_i32_0 : i32, i32
  }
  func.func @transform_3(%arg0: i32) -> (i32, i32) {
    %c0_i32 = arith.constant 0 : i32
    %c0_i32_0 = arith.constant 0 : i32
    %c0_i32_1 = arith.constant 0 : i32
    return %c0_i32, %c0_i32_0 : i32, i32
  }
  func.func @transform_4(%arg0: i32) -> (i32, i32) {
    %c0_i32 = arith.constant 0 : i32
    %c0_i32_0 = arith.constant 0 : i32
    return %arg0, %c0_i32 : i32, i32
  }
}

</mosaic_0001>

<bundles_post_ra>
// kernel: res_block_2d.3
= control target key start
LH: loop header
LB: loop body
LE: loop exit
PB: predicated region body
PF: predicated region fallthrough
CT: control target
= control target key end

     0   :  { %s2060_s27 = smov 0   ;;  %s2416_s0 = inlined_call_operand.vmem [shape: f32[512,4], index: 0, kind: input, shape index: {}, may-alias: {0,1,2}]   ;;  %s2417_s1 = inlined_call_operand.vmem [shape: f32[512,4], index: 1, kind: input, shape index: {}, may-alias: {0,1,2}]   ;;  %s2418_s2 = inlined_call_operand.vmem [shape: f32[512,4], index: 2, kind: input, shape index: {}, may-alias: {0,1,2}]   ;;  %s2419_s3 = inlined_call_operand.vmem [shape: f32[1,4], index: 3, kind: input, shape index: {}]   ;;  %s2420_s4 = inlined_call_operand.vmem [shape: f32[1,4], index: 4, kind: input, shape index: {}]   ;;  %s2421_s5 = inlined_call_operand.vmem [shape: bf16[9,4,4], index: 5, kind: input, shape index: {}]   ;;  %s2422_s6 = inlined_call_operand.vmem [shape: f32[1,4], index: 6, kind: input, shape index: {}]   ;;  %s2423_s7 = inlined_call_operand.vmem [shape: bf16[512,4], index: 7, kind: output, shape index: {0}]   ;;  %s2424_s8 = inlined_call_operand.vmem [shape: f32[8,2,4], index: 8, kind: output, shape index: {1}]  }
   0x1 LB: > { %s2066_s3 = sadd.s32 4294967295, %s2013_s27   ;;  %p1698_p0 = scmp.ge.s32.totalorder %s2013_s27, 1  ;;  %s2013_s27 = sphi %s2060_s27, %s19_s27  }
   0x2   : > { %p320_p1 = scmp.lt.s32.totalorder %s2013_s27, 9 }
   0x4   : > { %p321_p2 = pnand %p1698_p0, %p320_p1 }
   0x5   : > { %vm661_vm0 = vcmask (!%p321_p2), 1041408   ;;  %v2073_v0 = vld [vmem:[%s2421_s5 + $0x8] sm:$0x3] (!%p321_p2)  ;;  %s1703_s29 = sshll.u32 (!%p321_p2), %s2066_s3, 3  ;;  %v455_v1 = vlaneseq (!%p321_p2)  ;;  %v1717_v3 = vld [vmem:[%s2421_s5 + $0x2] sm:$0x3] (!%p321_p2) }
   0x6   : > { %324 = sbr.rel (%p321_p2) target bundleno = 354 (0x162), region = 48  ;;  %1993 = vmatprep.subr.msk.bf16.mxu0 (!%p321_p2), %vm661_vm0, %v2073_v0  ;;  %v2080_v2 = vsel (!%p321_p2), %vm661_vm0, %v2073_v0, 0  ;;  %p391_p3 = scmp.lt.s32.totalorder (!%p321_p2), %s1703_s29, 63  ;;  %1989 = vmatprep.subr.msk.bf16.mxu1 (!%p321_p2), %vm661_vm0, %v1717_v3  ;;  %v663_v4 = vsel (!%p321_p2), %vm661_vm0, %v1717_v3, 0  ;;  %v2094_v5 = vld [vmem:[%s2421_s5] sm:$0x3] (!%p321_p2) }
   0x7   : > { %s1699_s10 = sshll.u32 (!%p321_p2), %s2066_s3, 2  ;;  %1874 = vmatpush3.bf16.msra.mxu0 (!%p321_p2), %v2080_v2  ;;  %v2096_v6 = vshrl.u32 (!%p321_p2), %v455_v1, 7  ;;  %1834 = vmatpush3.bf16.msra.mxu1 (!%p321_p2), %v663_v4  ;;  %v1741_v7 = vld [vmem:[%s2421_s5 + $0xa] sm:$0x3] (!%p321_p2)  ;;  %p421_p6 = scmp.lt.s32.totalorder (!%p321_p2), %s2066_s3, 0  ;;  %vm464_vm1 = vcmask (!%p321_p2), 1040384  }
   0x8   : > { %s1700_s11 = sadd.s32 (!%p321_p2), 4294967295, %s1699_s10  ;;  %s2089_s12 = sadd.s32 (!%p321_p2), 4, %s1699_s10  ;;  %1990 = vmatprep.subr.msk.bf16.mxu1 (!%p321_p2), %vm661_vm0, %v2094_v5  ;;  %1995 = vmatprep.subr.msk.bf16.mxu0 (!%p321_p2), %vm661_vm0, %v1741_v7  ;;  %vm495_vm2 = vcmask (!%p321_p2), 31744   ;;  %v2119_v9 = vsel (!%p321_p2), %vm661_vm0, %v1741_v7, 0  ;;  %vm480_vm3 = vcmask (!%p321_p2), 1046528   ;;  %vm1515_vm6 = vcmask (!%p321_p2), 27648  }
   0x9   : > { %p378_p4 = scmp.gt.s32.totalorder (!%p321_p2), %s1700_s11, 0  ;;  %p398_p5 = scmp.lt.s32.totalorder (!%p321_p2), %s2089_s12, 31  ;;  %v2108_v8 = vadd.s32 (!%p321_p2), 8, %v2096_v6  ;;  %vm458_vm5 = vcmp.gt.s32.totalorder (!%p321_p2), %v2096_v6, 0  ;;  %v1746_v1 = vld [vmem:[%s2421_s5 + $0xc] sm:$0x3] (!%p321_p2) }
   0xa   : > { %s422_s21 = ssub.s32 (!%p321_p2), 0, %s2066_s3  ;;  %s2214_s28 = sadd.s32 (!%p321_p2), 1, %s2066_s3  ;;  %vm1575_vm7 = vcmask (!%p321_p2), 25600  }
   0xb   : > { %vm479_vm4 = vcmp.lt.s32.totalorder (!%p321_p2), %v2108_v8, 15  ;;  %s2149_s23 = smin.u32 (!%p321_p2), %s2066_s3, %s422_s21  ;;  %s437_s14 = ssub.s32 (!%p321_p2), 0, %s2214_s28  ;;  %v1756_v8 = vld [vmem:[%s2421_s5 + $0x10] sm:$0x3] (!%p321_p2) }
   0xc   : > { %s424_s25 = sand.u32 (!%p321_p2), 3, %s2149_s23   ;;  %p436_p10 = scmp.lt.s32.totalorder (!%p321_p2), %s2214_s28, 0 }
   0xd   : > { %s2426_s29 = smov (!%p391_p3, %s1703_s29), 63  ;;  %s2428_s11 = smov (!%p378_p4, %s1700_s11), 0 }
   0xe   : > { %s1704_s17 = sshll.u32 %s2426_s29, 3  ;;  %s2430_s12 = smov (!%p398_p5, %s2089_s12), 31 }
   0xf   : > { %s2115_s20 = scalar_lea.vmem %s2417_s1, %s1704_s17  ;;  %s1701_s22 = sshll.u32 %s2428_s11, 1 }
  0x10   : > { %v501_v10 = vld [vmem:[%s2115_s20] sm:$0xff]  ;;  %v2123_v11 = vld [vmem:[%s2115_s20 + $0x8] sm:$0xff]  ;;  %v2126_v12 = vld [vmem:[%s2115_s20 + $0x38] sm:$0xff]  ;;  %p381_p7 = scmp.lt.s32.totalorder %s1701_s22, 63  ;;  %s1706_s24 = sshll.u32 %s2430_s12, 1 }
  0x11   : > { %v510_v13 = vrot.slane %v2126_v12, 7  ;;  %v519_v14 = vrot.slane %v501_v10, 7  ;;  %v520_v15 = vrot.slane %v2123_v11, 7  ;;  %v554_v16 = vpack.c.bf16 %v2123_v11, %v501_v10  ;;  %v503_v17 = vld [vmem:[%s2115_s20 + $0x10] sm:$0xff]  ;;  %v2138_v18 = vld [vmem:[%s2115_s20 + $0x18] sm:$0xff]  ;;  %v2152_v23 = vld [vmem:[%s2115_s20 + $0x20] sm:$0xff]  ;;  %s1714_s15 = smin.u32 %s437_s14, %s2214_s28 }
  0x12   : > { %v558_v19 = vrot.slane %v501_v10, 1  ;;  %v559_v20 = vrot.slane %v2123_v11, 1  ;;  %v522_v21 = vrot.slane %v503_v17, 7  ;;  %v524_v22 = vrot.slane %v2138_v18, 7  ;;  %v2162_v28 = vld [vmem:[%s2115_s20 + $0x28] sm:$0xff]  ;;  %v2165_v29 = vld [vmem:[%s2115_s20 + $0x30] sm:$0xff] }
  0x13   : > { %v541_v24 = vsel %vm464_vm1, %v510_v13, %v519_v14  ;;  %599 = vst.msk [vmem:[#allocation2 + $0x38] sm:$0xff] %vm495_vm2, %v554_v16  ;;  %v555_v25 = vpack.c.bf16 %v2138_v18, %v503_v17  ;;  %v561_v26 = vrot.slane %v503_v17, 1  ;;  %v563_v27 = vrot.slane %v2138_v18, 1  ;;  %p401_p8 = scmp.lt.s32.totalorder %s1706_s24, 63  ;;  %s2432_s22 = smov (!%p381_p7, %s1701_s22), 63 }
  0x14   : > { %v560_v30 = vsel %vm480_vm3, %v558_v19, %v559_v20  ;;  %v565_v31 = vrot.slane %v2152_v23, 1  ;;  %v528_v32 = vrot.slane %v2162_v28, 7  ;;  %v556_v33 = vpack.c.bf16 %v2162_v28, %v2152_v23  ;;  %s425_s26 = ssub.s32 0, %s424_s25  ;;  %s1702_s4 = sshll.u32 %s2432_s22, 3 }
  0x15   : > { %600 = vst.msk [vmem:[#allocation2 + $0x40] sm:$0xff] %vm495_vm2, %v555_v25  ;;  %v562_v34 = vsel %vm480_vm3, %v559_v20, %v561_v26  ;;  %v564_v35 = vsel %vm480_vm3, %v561_v26, %v563_v27  ;;  %v567_v36 = vrot.slane %v2162_v28, 1  ;;  %v569_v37 = vrot.slane %v2165_v29, 1  ;;  %s2434_s24 = smov (!%p401_p8, %s1706_s24), 63  ;;  %s2436_s26 = smov (!%p421_p6, %s425_s26), %s424_s25 }
  0x16   : > { %v584_v38 = vsel %vm479_vm4, %v562_v34, 0.0  ;;  %v566_v39 = vsel %vm480_vm3, %v563_v27, %v565_v31  ;;  %601 = vst.msk [vmem:[#allocation2 + $0x48] sm:$0xff] %vm495_vm2, %v556_v33  ;;  %v571_v40 = vrot.slane %v2126_v12, 1  ;;  %v521_v41 = vsel %vm464_vm1, %v519_v14, %v520_v15  ;;  %p1713_p9 = scmp.lt.s32.totalorder %s2436_s26, 0  ;;  %s431_s30 = sadd.s32 4, %s2436_s26 }
  0x17   : > { %v591_v42 = vpack.c.bf16 %v584_v38, %v560_v30  ;;  %v586_v43 = vsel %vm479_vm4, %v566_v39, 0.0  ;;  %v568_v44 = vsel %vm480_vm3, %v565_v31, %v567_v36  ;;  %v570_v45 = vsel %vm480_vm3, %v567_v36, %v569_v37  ;;  %s384_s11 = scalar_lea.vmem %s2416_s0, %s1702_s4  ;;  %s439_s16 = sand.u32 3, %s1714_s15   ;;  %v1751_v30 = vld [vmem:[%s2421_s5 + $0xe] sm:$0x3] }
  0x18   : > { %v592_v46 = vpack.c.bf16 %v586_v43, %v564_v35  ;;  %v588_v47 = vsel %vm479_vm4, %v570_v45, 0.0  ;;  %v572_v48 = vsel %vm480_vm3, %v569_v37, %v571_v40  ;;  %v582_v49 = vsel %vm480_vm3, %v571_v40, %v558_v19  ;;  %s2438_s30 = smov (!%p1713_p9, %s431_s30), %s2436_s26  ;;  %s440_s17 = ssub.s32 0, %s439_s16  ;;  %v451_v16 = vld [vmem:[%s384_s11 + $0x8] sm:$0xff] }
  0x19   : > { %603 = vst.msk [vmem:[#allocation2 + $0x68] sm:$0xff] %vm495_vm2, %v591_v42  ;;  %v593_v50 = vpack.c.bf16 %v588_v47, %v568_v44  ;;  %v590_v51 = vsel %vm479_vm4, %v582_v49, 0.0  ;;  %v542_v52 = vsel %vm458_vm5, %v541_v24, 0.0  ;;  %v523_v53 = vsel %vm464_vm1, %v520_v15, %v522_v21  ;;  %p433_p11 = scmp.eq.s32.totalorder %s2438_s30, 0  ;;  %s2440_s17 = smov (!%p436_p10, %s440_s17), %s439_s16  ;;  %v1726_v49 = vld [vmem:[%s2421_s5 + $0x4] sm:$0x3] }
  0x1a   : > { %v2205_v54 = vld [vmem:[#allocation2 + $0x38] sm:$0xff]  ;;  %604 = vst.msk [vmem:[#allocation2 + $0x70] sm:$0xff] %vm495_vm2, %v592_v46  ;;  %v594_v55 = vpack.c.bf16 %v590_v51, %v572_v48  ;;  %v550_v56 = vpack.c.bf16 %v521_v41, %v542_v52  ;;  %v525_v57 = vsel %vm464_vm1, %v522_v21, %v524_v22  ;;  %v544_v58 = vsel %vm458_vm5, %v523_v53, 0.0  ;;  %s1707_s19 = sshll.u32 %s2434_s24, 3  ;;  %p1716_p12 = scmp.lt.s32.totalorder %s2440_s17, 0 }
  0x1b   : > { %1875 = vmatprep.mubr.msk.bf16.mxu0 %vm495_vm2, %v2205_v54  ;;  %605 = vst.msk [vmem:[#allocation2 + $0x78] sm:$0xff] %vm495_vm2, %v593_v50  ;;  %v551_v59 = vpack.c.bf16 %v525_v57, %v544_v58  ;;  %v526_v60 = vrot.slane %v2152_v23, 7  ;;  %v530_v61 = vrot.slane %v2165_v29, 7  ;;  %v557_v62 = vpack.c.bf16 %v2126_v12, %v2165_v29  ;;  %s434_s18 = scalar_select %p433_p11, 0.0, 1.0 }
  0x1c   : > { %v2223_v63 = vld [vmem:[#allocation2 + $0x40] sm:$0xff]  ;;  %606 = vst.msk [vmem:[#allocation2 + $0x80] sm:$0xff] %vm495_vm2, %v594_v55  ;;  %595 = vst.msk [vmem:[#allocation2 + $0x8] sm:$0xff] %vm495_vm2, %v550_v56  ;;  %s446_s20 = sadd.s32 4, %s2440_s17  ;;  %v1205_v26 = vsel %vm661_vm0, %v1746_v1, 0  ;;  %s404_s23 = scalar_lea.vmem %s2418_s2, %s1707_s19  ;;  %v743_v42 = vsel %vm661_vm0, %v2094_v5, 0 }
  0x1d   : > { %1876 = vmatmul.mubr.msk.bf16.vlgmr.msra.gmra.mrb[0].mxu0 %vm495_vm2, %v2223_v63  ;;  %596 = vst.msk [vmem:[#allocation2 + $0x10] sm:$0xff] %vm495_vm2, %v551_v59  ;;  %v527_v3 = vsel %vm464_vm1, %v524_v22, %v526_v60  ;;  %v529_v4 = vsel %vm464_vm1, %v526_v60, %v528_v32  ;;  %v531_v7 = vsel %vm464_vm1, %v528_v32, %v530_v61  ;;  %602 = vst.msk [vmem:[#allocation2 + $0x50] sm:$0xff] %vm495_vm2, %v557_v62  ;;  %s2442_s20 = smov (!%p1716_p12, %s446_s20), %s2440_s17  ;;  %v607_v35 = vld [vmem:[%s404_s23] sm:$0xff]  ;;  %v608_v36 = vld [vmem:[%s404_s23 + $0x8] sm:$0xff]  ;;  %s1709_s14 = sshll.u32 %s2426_s29, 2 }
  0x1e   : > { %v532_v10 = vsel %vm464_vm1, %v530_v61, %v510_v13  ;;  %1884 = vmatpush3.bf16.msra.mxu0 %v2119_v9  ;;  %v546_v11 = vsel %vm458_vm5, %v527_v3, 0.0  ;;  %v548_v14 = vsel %vm458_vm5, %v531_v7, 0.0  ;;  %v450_v9 = vld [vmem:[%s384_s11] sm:$0xff]  ;;  %v452_v17 = vstv %s434_s18  ;;  %p448_p13 = scmp.eq.s32.totalorder %s2442_s20, 0  ;;  %v646_v59 = vld [vmem:[#allocation2 + $0x48] sm:$0xff]  ;;  %s2373_s17 = scalar_lea.vmem %s2423_s7, %s1709_s14 }
  0x1f   : > { %1996 = vmatprep.subr.msk.bf16.mxu0 %vm661_vm0, %v1746_v1  ;;  %v552_v12 = vpack.c.bf16 %v529_v4, %v546_v11  ;;  %v553_v15 = vpack.c.bf16 %v532_v10, %v548_v14  ;;  %v453_v18 = vmul.f32 %v452_v17, %v450_v9  ;;  %v454_v19 = vmul.f32 %v452_v17, %v451_v16  ;;  %v1731_v7 = vld [vmem:[%s2421_s5 + $0x6] sm:$0x3]  ;;  %p416_p0 = scmp.lt.s32.totalorder %s2066_s3, 7 }
  0x20   : > { %v2255_v13 = vld [vmem:[#allocation2 + $0x68] sm:$0xff]  ;;  %s449_s26 = scalar_select %p448_p13, 0.0, 1.0  ;;  %v1299_v62 = vsel %vm661_vm0, %v1751_v30, 0  ;;  %v829_v4 = vsel %vm661_vm0, %v1726_v49, 0  ;;  %v1393_v14 = vsel %vm661_vm0, %v1756_v8, 0 }
  0x21   : > { %1885 = vmatprep.mubr.msk.bf16.mxu0 %vm495_vm2, %v2255_v13  ;;  %597 = vst.msk [vmem:[#allocation2 + $0x18] sm:$0xff] %vm495_vm2, %v552_v12  ;;  %598 = vst.msk [vmem:[#allocation2 + $0x20] sm:$0xff] %vm495_vm2, %v553_v15  ;;  %v477_v20 = vpack.c.bf16 %v454_v19, %v453_v18  ;;  %v2264_v21 = vld [vmem:[#allocation2 + $0x70] sm:$0xff]  ;;  %v461_v22 = vrot.slane %v454_v19, 7  ;;  %v465_v23 = vrot.slane %v453_v18, 7  ;;  %v481_v24 = vrot.slane %v453_v18, 1 }
  0x22   : > { %v2266_v25 = vld [vmem:[#allocation2 + $0x78] sm:$0xff]  ;;  %v482_v27 = vrot.slane %v454_v19, 1  ;;  %v609_v39 = vstv %s449_s26  ;;  %v923_v15 = vsel %vm661_vm0, %v1731_v7, 0  ;;  %v1761_v18 = vld [vmem:[%s2422_s6] ss:$0 sm:$0xff]  ;;  %s2444_s3 = smov (!%p416_p0, %s2066_s3), 7 }
  0x23   : > { %498 = vst.msk [vmem:[#allocation2 + $0x30] sm:$0xff] %vm495_vm2, %v477_v20  ;;  %v466_v28 = vsel %vm464_vm1, %v465_v23, %v461_v22  ;;  %v469_v29 = vsel %vm464_vm1, %v461_v22, %v465_v23  ;;  %v610_v40 = vmul.f32 %v609_v39, %v607_v35  ;;  %v611_v41 = vmul.f32 %v609_v39, %v608_v36  ;;  %v2293_v43 = vld [vmem:[#allocation2 + $0x80] sm:$0xff]  ;;  %v639_v1 = vld [vmem:[#allocation2 + $0x8] sm:$0xff]  ;;  %s1710_s29 = sshll.u32 %s2444_s3, 1 }
  0x24   : > { %v474_v31 = vsel %vm458_vm5, %v469_v29, 0.0  ;;  %v483_v32 = vsel %vm480_vm3, %v481_v24, %v482_v27  ;;  %v487_v33 = vsel %vm480_vm3, %v482_v27, %v481_v24  ;;  %v1186_v50 = vld [vmem:[#allocation2 + $0x10] sm:$0xff]  ;;  %s419_s20 = scalar_lea.vmem %s2424_s8, %s1710_s29 }
  0x25   : > { %v476_v34 = vpack.c.bf16 %v466_v28, %v474_v31  ;;  %v493_v37 = vsel %vm479_vm4, %v487_v33, 0.0  ;;  %v613_v45 = vrot.slane %v611_v41, 7  ;;  %v616_v46 = vrot.slane %v610_v40, 7  ;;  %v1282_v11 = vld [vmem:[#allocation2 + $0x50] sm:$0xff] }
  0x26   : > { %v494_v38 = vpack.c.bf16 %v493_v37, %v483_v32  ;;  %v624_v47 = vpack.c.bf16 %v611_v41, %v610_v40  ;;  %v625_v48 = vrot.slane %v610_v40, 1  ;;  %v626_v51 = vrot.slane %v611_v41, 1 }
  0x27   : > { %496 = vst.msk [vmem:[#allocation2] sm:$0xff] %vm495_vm2, %v476_v34  ;;  %v617_v5 = vsel %vm464_vm1, %v616_v46, %v613_v45  ;;  %v620_v52 = vsel %vm464_vm1, %v613_v45, %v616_v46 }
  0x28   : > { %500 = vst.msk [vmem:[#allocation2 + $0x60] sm:$0xff] %vm495_vm2, %v494_v38  ;;  %636 = vst.msk [vmem:[#allocation2 + $0x58] sm:$0xff] %vm495_vm2, %v624_v47  ;;  %v621_v53 = vsel %vm458_vm5, %v620_v52, 0.0  ;;  %v627_v55 = vsel %vm480_vm3, %v625_v48, %v626_v51  ;;  %v1187_v60 = vld [vmem:[#allocation2 + $0x18] sm:$0xff]  ;;  %v1188_v61 = vld [vmem:[#allocation2 + $0x20] sm:$0xff] }
  0x29   : > { %1886 = vmatmul.mubr.msk.bf16.vlgmr.msra.gmra.mrb[0].mxu0 %vm495_vm2, %v2264_v21  ;;  %v623_v56 = vpack.c.bf16 %v617_v5, %v621_v53 }
  0x2a   : > { %1889 = vmatprep.mubr.msk.bf16.mxu0 %vm495_vm2, %v2266_v25  ;;  %1894 = vmatpush3.bf16.msra.mxu0 %v1205_v26  ;;  %v643_v44 = vld [vmem:[#allocation2 + $0x30] sm:$0xff] }
  0x2b   : > { %1997 = vmatprep.subr.msk.bf16.mxu0 %vm661_vm0, %v1751_v30  ;;  %1835 = vmatprep.mubr.msk.bf16.mxu1 %vm495_vm2, %v643_v44  ;;  %635 = vst.msk [vmem:[#allocation2 + $0x28] sm:$0xff] %vm495_vm2, %v623_v56 }
  0x2c   : > { %1836 = vmatmul.mubr.msk.bf16.vlgmr.msra.gmra.mrb[0].mxu1 %vm495_vm2, %v2205_v54  ;;  %v631_v54 = vsel %vm480_vm3, %v626_v51, %v625_v48 }
  0x2d   : > { %1844 = vmatpush3.bf16.msra.mxu1 %v743_v42  ;;  %1839 = vmatprep.mubr.msk.bf16.mxu1 %vm495_vm2, %v2223_v63  ;;  %v633_v57 = vsel %vm479_vm4, %v631_v54, 0.0 }
  0x2e   : > { %1991 = vmatprep.subr.msk.bf16.mxu1 %vm661_vm0, %v1726_v49  ;;  %v634_v58 = vpack.c.bf16 %v633_v57, %v627_v55  ;;  %v638_v6 = vld [vmem:[#allocation2] sm:$0xff] }
  0x2f   : > { %v810_v10 = vld [vmem:[#allocation2 + $0x60] sm:$0xff]  ;;  %v1283_v12 = vld [vmem:[#allocation2 + $0x58] sm:$0xff] }
  0x30   : > { %637 = vst.msk [vmem:[#allocation2 + $0x88] sm:$0xff] %vm495_vm2, %v634_v58 }
  0x31   : > { %1890 = vmatmul.mubr.msk.bf16.gmra.mrb[4].mxu0 %vm495_vm2, %v2293_v43 }
  0x32   : > { %1895 = vmatprep.mubr.msk.bf16.mxu0 %vm495_vm2, %v1186_v50  ;;  %v1189_v3 = vld [vmem:[#allocation2 + $0x28] sm:$0xff] }
  0x34   : > { %1840 = vmatmul.mubr.msk.bf16.gmra.mrb[4].mxu1 %vm495_vm2, %v646_v59 }
  0x35   : > { %1845 = vmatprep.mubr.msk.bf16.mxu1 %vm495_vm2, %v638_v6 }
  0x39   : > { %1896 = vmatmul.mubr.msk.bf16.vlgmr.msra.gmra.mrb[0].mxu0 %vm495_vm2, %v1187_v60 }
  0x3a   : > { %1899 = vmatprep.mubr.msk.bf16.mxu0 %vm495_vm2, %v1188_v61  ;;  %1904 = vmatpush3.bf16.msra.mxu0 %v1299_v62 }
  0x3b   : > { %1998 = vmatprep.subr.msk.bf16.mxu0 %vm661_vm0, %v1756_v8 }
  0x3c   : > { %1846 = vmatmul.mubr.msk.bf16.vlgmr.msra.gmra.mrb[0].mxu1 %vm495_vm2, %v639_v1 }
  0x3d   : > { %1854 = vmatpush3.bf16.msra.mxu1 %v829_v4  ;;  %1849 = vmatprep.mubr.msk.bf16.mxu1 %vm495_vm2, %v1186_v50 }
  0x3e   : > { %1992 = vmatprep.subr.msk.bf16.mxu1 %vm661_vm0, %v1731_v7 }
  0x41   : > { %1900 = vmatmul.mubr.msk.bf16.gmra.mrb[4].mxu0 %vm495_vm2, %v1189_v3 }
  0x42   : > { %1905 = vmatprep.mubr.msk.bf16.mxu0 %vm495_vm2, %v2223_v63  ;;  %v1377_v63 = vld [vmem:[#allocation2 + $0x88] sm:$0xff] }
  0x44   : > { %1850 = vmatmul.mubr.msk.bf16.gmra.mrb[4].mxu1 %vm495_vm2, %v1187_v60 }
  0x45   : > { %1855 = vmatprep.mubr.msk.bf16.mxu1 %vm495_vm2, %v810_v10 }
  0x49   : > { %1906 = vmatmul.mubr.msk.bf16.vlgmr.msra.gmra.mrb[0].mxu0 %vm495_vm2, %v646_v59 }
  0x4a   : > { %1909 = vmatprep.mubr.msk.bf16.mxu0 %vm495_vm2, %v1282_v11  ;;  %1914 = vmatpush3.bf16.msra.mxu0 %v1393_v14 }
  0x4c   : > { %1856 = vmatmul.mubr.msk.bf16.vlgmr.msra.gmra.mrb[0].mxu1 %vm495_vm2, %v2255_v13 }
  0x4d   : > { %1864 = vmatpush3.bf16.msra.mxu1 %v923_v15  ;;  %1859 = vmatprep.mubr.msk.bf16.mxu1 %vm495_vm2, %v2264_v21 }
  0x4e   : > { %1994 = vmatprep.subr.msk.bf16.mxu1 %vm661_vm0, %v2073_v0 }
  0x51   : > { %1910 = vmatmul.mubr.msk.bf16.gmra.mrb[4].mxu0 %vm495_vm2, %v1283_v12 }
  0x52   : > { %1915 = vmatprep.mubr.msk.bf16.mxu0 %vm495_vm2, %v2264_v21 }
  0x54   : > { %1860 = vmatmul.mubr.msk.bf16.gmra.mrb[4].mxu1 %vm495_vm2, %v2266_v25 }
  0x55   : > { %1865 = vmatprep.mubr.msk.bf16.mxu1 %vm495_vm2, %v639_v1 }
  0x59   : > { %1916 = vmatmul.mubr.msk.bf16.vlgmr.msra.gmra.mrb[0].mxu0 %vm495_vm2, %v2266_v25 }
  0x5a   : > { %1919 = vmatprep.mubr.msk.bf16.mxu0 %vm495_vm2, %v2293_v43 }
  0x5c   : > { %1866 = vmatmul.mubr.msk.bf16.vlgmr.msra.gmra.mrb[0].mxu1 %vm495_vm2, %v1186_v50 }
  0x5d   : > { %1924 = vmatpush3.bf16.msra.mxu1 %v2080_v2  ;;  %1869 = vmatprep.mubr.msk.bf16.mxu1 %vm495_vm2, %v1187_v60 }
  0x61   : > { %1920 = vmatmul.mubr.msk.bf16.gmra.mrb[4].mxu0 %vm495_vm2, %v1377_v63 }
  0x64   : > { %1870 = vmatmul.mubr.msk.bf16.gmra.mrb[4].mxu1 %vm495_vm2, %v1188_v61 }
  0x65   : > { %1879 = vmatprep.mubr.msk.bf16.mxu1 %vm495_vm2, %v646_v59 }
  0x70   : > { %1880 = vmatmul.mubr.msk.bf16.vlgmr.msra.gmra.mrb[4].mxu1 %vm495_vm2, %v1282_v11 }
 0x12c   : > { %v1917_v0 = vpop.f32.mrb[0].mxu0 }
 0x12d   : > { %v1429_v13 = vpop.f32.mrb[1].mxu0 }
 0x12e   : > { %v1918_v9 = vpop.f32.mrb[2].mxu0 }
 0x12f   : > { %v1432_v16 = vpop.f32.mrb[3].mxu0  ;;  %v1867_v17 = vpop.f32.mrb[0].mxu1 }
 0x130   : > { %v959_v20 = vpop.f32.mrb[1].mxu1  ;;  %v1925_v2 = vadd.f32 %v1917_v0, %v1867_v17 }
 0x131   : > { %v1868_v22 = vpop.f32.mrb[2].mxu1  ;;  %v1926_v23 = vadd.f32 %v1429_v13, %v959_v20 }
 0x132   : > { %v962_v25 = vpop.f32.mrb[3].mxu1  ;;  %v1477_v26 = vadd.f32 %v1925_v2, %v1761_v18  ;;  %v1927_v27 = vadd.f32 %v1918_v9, %v1868_v22 }
 0x133   : > { %v1475_v29 = vadd.f32 %v1926_v23, %v1761_v18  ;;  %v1928_v30 = vadd.f32 %v1432_v16, %v962_v25 }
 0x134   : > { %v1921_v19 = vpop.f32.mrb[4].mxu0  ;;  %v1782_v31 = vpack.c.bf16 %v1477_v26, %v1477_v26  ;;  %v1478_v32 = vadd.f32 %v1927_v27, %v1761_v18  ;;  %v1547_v36 = vmul.f32 %v1477_v26, %v1477_v26  ;;  %v1527_v43 = vsel %vm495_vm2, %v1477_v26, 0.0 }
 0x135   : > { %v1445_v21 = vpop.f32.mrb[5].mxu0  ;;  %v1780_v33 = vpack.c.bf16 %v1475_v29, %v1475_v29  ;;  %v1545_v34 = vmul.f32 %v1475_v29, %v1475_v29  ;;  %v1476_v35 = vadd.f32 %v1928_v30, %v1761_v18  ;;  %v1524_v38 = vsel %vm495_vm2, %v1475_v29, 0.0 }
 0x136   : > { %v1922_v24 = vpop.f32.mrb[6].mxu0  ;;  %1518 = vst.msk [vmem:[%s2373_s17 + $0x8] sm:$0xf] %vm1515_vm6, %v1782_v31  ;;  %v1783_v37 = vpack.c.bf16 %v1478_v32, %v1478_v32  ;;  %v1548_v45 = vmul.f32 %v1478_v32, %v1478_v32  ;;  %v1556_v49 = vsel %vm495_vm2, %v1547_v36, 0.0  ;;  %v1529_v50 = vsel %vm495_vm2, %v1478_v32, 0.0 }
 0x137   : > { %v1448_v28 = vpop.f32.mrb[7].mxu0  ;;  %1516 = vst.msk [vmem:[%s2373_s17] sm:$0xf] %vm1515_vm6, %v1780_v33  ;;  %v1781_v39 = vpack.c.bf16 %v1476_v35, %v1476_v35  ;;  %v1525_v40 = vsel %vm495_vm2, %v1476_v35, 0.0  ;;  %v1546_v41 = vmul.f32 %v1476_v35, %v1476_v35  ;;  %v1553_v44 = vsel %vm495_vm2, %v1545_v34, 0.0 }
 0x138   : > { %1519 = vst.msk [vmem:[%s2373_s17 + $0xc] sm:$0xf] %vm1515_vm6, %v1783_v37  ;;  %v1526_v42 = vadd.f32 %v1525_v40, %v1524_v38  ;;  %v1558_v52 = vsel %vm495_vm2, %v1548_v45, 0.0 }
 0x139   : > { %1517 = vst.msk [vmem:[%s2373_s17 + $0x4] sm:$0xf] %vm1515_vm6, %v1781_v39  ;;  %v1554_v46 = vsel %vm495_vm2, %v1546_v41, 0.0 }
 0x13a   : > { %v1528_v47 = vadd.f32 %v1527_v43, %v1526_v42  ;;  %v1555_v48 = vadd.f32 %v1554_v46, %v1553_v44 }
 0x13c   : > { %v1557_v51 = vadd.f32 %v1556_v49, %v1555_v48  ;;  %v1530_v5 = vadd.f32 %v1529_v50, %v1528_v47 }
 0x13e   : > { %v1559_v53 = vadd.f32 %v1558_v52, %v1557_v51 }
 0x143   : > { %v1881_v55 = vpop.f32.mrb[4].mxu1 }
 0x144   : > { %v1929_v54 = vadd.f32 %v1921_v19, %v1881_v55  ;;  %v1069_v56 = vpop.f32.mrb[5].mxu1 }
 0x145   : > { %v1930_v57 = vadd.f32 %v1445_v21, %v1069_v56  ;;  %v1882_v58 = vpop.f32.mrb[6].mxu1 }
 0x146   : > { %v1481_v59 = vadd.f32 %v1929_v54, %v1761_v18  ;;  %v1931_v60 = vadd.f32 %v1922_v24, %v1882_v58  ;;  %v1072_v6 = vpop.f32.mrb[7].mxu1 }
 0x147   : > { %v1479_v61 = vadd.f32 %v1930_v57, %v1761_v18  ;;  %v1932_v62 = vadd.f32 %v1448_v28, %v1072_v6 }
 0x148   : > { %v1786_v8 = vpack.c.bf16 %v1481_v59, %v1481_v59  ;;  %v1482_v1 = vadd.f32 %v1931_v60, %v1761_v18  ;;  %v1551_v0 = vmul.f32 %v1481_v59, %v1481_v59  ;;  %v1535_v17 = vsel %vm495_vm2, %v1481_v59, 0.0 }
 0x149   : > { %v1784_v3 = vpack.c.bf16 %v1479_v61, %v1479_v61  ;;  %v1531_v4 = vsel %vm495_vm2, %v1479_v61, 0.0  ;;  %v1549_v7 = vmul.f32 %v1479_v61, %v1479_v61  ;;  %v1480_v10 = vadd.f32 %v1932_v62, %v1761_v18 }
 0x14a   : > { %1522 = vst.msk [vmem:[%s2373_s17 + $0x18] sm:$0xf] %vm1515_vm6, %v1786_v8  ;;  %v1532_v11 = vadd.f32 %v1531_v4, %v1530_v5  ;;  %v1787_v14 = vpack.c.bf16 %v1482_v1, %v1482_v1  ;;  %v1552_v18 = vmul.f32 %v1482_v1, %v1482_v1  ;;  %v1537_v2 = vsel %vm495_vm2, %v1482_v1, 0.0 }
 0x14b   : > { %1520 = vst.msk [vmem:[%s2373_s17 + $0x10] sm:$0xf] %vm1515_vm6, %v1784_v3  ;;  %v1560_v12 = vsel %vm495_vm2, %v1549_v7, 0.0  ;;  %v1785_v15 = vpack.c.bf16 %v1480_v10, %v1480_v10  ;;  %v1533_v63 = vsel %vm495_vm2, %v1480_v10, 0.0  ;;  %v1550_v16 = vmul.f32 %v1480_v10, %v1480_v10 }
 0x14c   : > { %v1561_v13 = vadd.f32 %v1560_v12, %v1559_v53  ;;  %1523 = vst.msk [vmem:[%s2373_s17 + $0x1c] sm:$0xf] %vm1515_vm6, %v1787_v14  ;;  %v1534_v9 = vadd.f32 %v1533_v63, %v1532_v11  ;;  %v1564_v22 = vsel %vm495_vm2, %v1551_v0, 0.0  ;;  %v1566_v25 = vsel %vm495_vm2, %v1552_v18, 0.0 }
 0x14d   : > { %1521 = vst.msk [vmem:[%s2373_s17 + $0x14] sm:$0xf] %vm1515_vm6, %v1785_v15  ;;  %v1562_v20 = vsel %vm495_vm2, %v1550_v16, 0.0 }
 0x14e   : > { %v1536_v19 = vadd.f32 %v1535_v17, %v1534_v9  ;;  %v1563_v21 = vadd.f32 %v1562_v20, %v1561_v13 }
 0x150   : > { %v1538_v23 = vadd.f32 %v1537_v2, %v1536_v19  ;;  %v1565_v24 = vadd.f32 %v1564_v22, %v1563_v21 }
 0x152   : > { %v1539_v26 = vrot.slane %v1538_v23, 4  ;;  %v1567_v27 = vadd.f32 %v1566_v25, %v1565_v24 }
 0x154   : > { %v1540_v28 = vadd.f32 %v1539_v26, %v1538_v23  ;;  %v1568_v29 = vrot.slane %v1567_v27, 4 }
 0x156   : > { %v1541_v30 = vrot.slane %v1540_v28, 2  ;;  %v1569_v31 = vadd.f32 %v1568_v29, %v1567_v27 }
 0x158   : > { %v1542_v32 = vadd.f32 %v1541_v30, %v1540_v28  ;;  %v1570_v33 = vrot.slane %v1569_v31, 2 }
 0x15a   : > { %v1543_v34 = vrot.slane %v1542_v32, 1  ;;  %v1571_v35 = vadd.f32 %v1570_v33, %v1569_v31 }
 0x15c   : > { %v1572_v36 = vrot.slane %v1571_v35, 1  ;;  %v1544_v37 = vadd.f32 %v1543_v34, %v1542_v32 }
 0x15e   : > { %v1573_v38 = vadd.f32 %v1572_v36, %v1571_v35 }
 0x160   : > { %v1574_v39 = vsel %vm464_vm1, %v1544_v37, %v1573_v38 }
 0x161   : > { %1576 = vst.msk [vmem:[%s419_s20] sm:$0x3] %vm1575_vm7, %v1574_v39 }
 0x162 PF: > { %s19_s27 = sadd.s32 1, %s2013_s27  }
 0x163   : > { %p16_p1 = scmp.ge.s32.totalorder %s19_s27, 10  }
 0x165   :  { %18 = sbr.rel (!%p16_p1) target bundleno = 1 (0x1), region = 106 }

// kernel: res_block_2d.4
= control target key start
LH: loop header
LB: loop body
LE: loop exit
PB: predicated region body
PF: predicated region fallthrough
CT: control target
= control target key end

     0   :  { %s2315_s27 = smov 0   ;;  %s2758_s0 = inlined_call_operand.vmem [shape: bf16[512,4], index: 0, kind: input, shape index: {}, may-alias: {0,1,2}]   ;;  %s2759_s1 = inlined_call_operand.vmem [shape: bf16[512,4], index: 1, kind: input, shape index: {}, may-alias: {0,1,2}]   ;;  %s2760_s2 = inlined_call_operand.vmem [shape: bf16[512,4], index: 2, kind: input, shape index: {}, may-alias: {0,1,2}]   ;;  %s2761_s3 = inlined_call_operand.vmem [shape: f32[1,4], index: 3, kind: input, shape index: {}]   ;;  %s2762_s4 = inlined_call_operand.vmem [shape: f32[1,4], index: 4, kind: input, shape index: {}]   ;;  %s2763_s5 = inlined_call_operand.vmem [shape: bf16[9,4,4], index: 5, kind: input, shape index: {}]   ;;  %s2764_s6 = inlined_call_operand.vmem [shape: f32[1,4], index: 6, kind: input, shape index: {}]   ;;  %s2765_s7 = inlined_call_operand.vmem [shape: bf16[512,4], index: 7, kind: output, shape index: {0}]   ;;  %s2766_s8 = inlined_call_operand.vmem [shape: f32[8,2,4], index: 8, kind: output, shape index: {1}]  }
   0x1 LB: > { %s2321_s28 = sadd.s32 4294967295, %s2268_s27   ;;  %p1860_p0 = scmp.ge.s32.totalorder %s2268_s27, 1  ;;  %s2268_s27 = sphi %s2315_s27, %s19_s27  }
   0x2   : > { %p320_p1 = scmp.lt.s32.totalorder %s2268_s27, 9 }
   0x4   : > { %p321_p2 = pnand %p1860_p0, %p320_p1 }
   0x5   : > { %vm823_vm0 = vcmask (!%p321_p2), 1041408   ;;  %v2328_v0 = vld [vmem:[%s2763_s5 + $0x8] sm:$0x3] (!%p321_p2)  ;;  %s1865_s9 = sshll.u32 (!%p321_p2), %s2321_s28, 3  ;;  %s1861_s10 = sshll.u32 (!%p321_p2), %s2321_s28, 2  ;;  %vm529_vm1 = vcmask (!%p321_p2), 31744  }
   0x6   : > { %324 = sbr.rel (%p321_p2) target bundleno = 384 (0x180), region = 48  ;;  %2200 = vmatprep.subr.msk.bf16.mxu0 (!%p321_p2), %vm823_vm0, %v2328_v0  ;;  %v2336_v1 = vsel (!%p321_p2), %vm823_vm0, %v2328_v0, 0  ;;  %p391_p3 = scmp.lt.s32.totalorder (!%p321_p2), %s1865_s9, 63  ;;  %v1897_v2 = vld [vmem:[%s2763_s5 + $0x2] sm:$0x3] (!%p321_p2)  ;;  %vm514_vm2 = vcmask (!%p321_p2), 1046528  }
   0x7   : > { %2081 = vmatpush3.bf16.msra.mxu0 (!%p321_p2), %v2336_v1  ;;  %s1862_s13 = sadd.s32 (!%p321_p2), 4294967295, %s1861_s10  ;;  %s1959_s14 = sadd.s32 (!%p321_p2), 4, %s1861_s10  ;;  %v2345_v3 = vld [vmem:[%s2763_s5] sm:$0x3] (!%p321_p2)  ;;  %2196 = vmatprep.subr.msk.bf16.mxu1 (!%p321_p2), %vm823_vm0, %v1897_v2  ;;  %v825_v4 = vsel (!%p321_p2), %vm823_vm0, %v1897_v2, 0  ;;  %vm498_vm3 = vcmask (!%p321_p2), 1040384  }
   0x8   : > { %v2354_v5 = vld [vmem:[%s2763_s5 + $0xa] sm:$0x3] (!%p321_p2)  ;;  %2041 = vmatpush3.bf16.msra.mxu1 (!%p321_p2), %v825_v4  ;;  %p378_p4 = scmp.gt.s32.totalorder (!%p321_p2), %s1862_s13, 0  ;;  %p398_p5 = scmp.lt.s32.totalorder (!%p321_p2), %s1959_s14, 31  ;;  %v2369_v6 = vld [vmem:[%s2761_s3] ss:$0 sm:$0xff] (!%p321_p2) }
   0x9   : > { %2202 = vmatprep.subr.msk.bf16.mxu0 (!%p321_p2), %vm823_vm0, %v2354_v5  ;;  %2197 = vmatprep.subr.msk.bf16.mxu1 (!%p321_p2), %vm823_vm0, %v2345_v3  ;;  %s422_s25 = ssub.s32 (!%p321_p2), 0, %s2321_s28  ;;  %v2376_v15 = vld [vmem:[%s2762_s4] ss:$0 sm:$0xff] (!%p321_p2)  ;;  %p421_p8 = scmp.lt.s32.totalorder (!%p321_p2), %s2321_s28, 0  ;;  %vm1677_vm6 = vcmask (!%p321_p2), 27648   ;;  %vm1737_vm7 = vcmask (!%p321_p2), 25600  }
   0xa   : > { %s2379_s10 = smin.u32 (!%p321_p2), %s2321_s28, %s422_s25  ;;  %s2430_s23 = sadd.s32 (!%p321_p2), 1, %s2321_s28 }
   0xb   : > { %s424_s12 = sand.u32 (!%p321_p2), 3, %s2379_s10   ;;  %s437_s24 = ssub.s32 (!%p321_p2), 0, %s2430_s23 }
   0xc   : > { %s425_s18 = ssub.s32 (!%p321_p2), 0, %s424_s12  ;;  %p436_p9 = scmp.lt.s32.totalorder (!%p321_p2), %s2430_s23, 0 }
   0xd   : > { %s2768_s9 = smov (!%p391_p3, %s1865_s9), 63  ;;  %s2770_s13 = smov (!%p378_p4, %s1862_s13), 0 }
   0xe   : > { %s1866_s19 = sshll.u32 %s2768_s9, 2  ;;  %s2772_s14 = smov (!%p398_p5, %s1959_s14), 31 }
   0xf   : > { %s394_s22 = scalar_lea.vmem %s2759_s1, %s1866_s19  ;;  %s1863_s30 = sshll.u32 %s2770_s13, 1 }
  0x10   : > { %v1973_v7 = vld [vmem:[%s394_s22] sm:$0xff]   ;;  %v1993_v8 = vld [vmem:[%s394_s22 + $0x10] sm:$0xff]   ;;  %v1994_v9 = vld [vmem:[%s394_s22 + $0x18] sm:$0xff]   ;;  %p381_p6 = scmp.lt.s32.totalorder %s1863_s30, 63  ;;  %s1868_s11 = sshll.u32 %s2772_s14, 1 }
  0x11   : > { %v1974_v10 = vunpack.c.l.bf16 %v1973_v7  ;;  %v1975_v11 = vunpack.c.h.bf16 %v1973_v7  ;;  %v1982_v12 = vunpack.c.l.bf16 %v1993_v8  ;;  %v1992_v13 = vld [vmem:[%s394_s22 + $0x8] sm:$0xff]   ;;  %v1983_v14 = vunpack.c.h.bf16 %v1993_v8  ;;  %p401_p7 = scmp.lt.s32.totalorder %s1868_s11, 63  ;;  %s2778_s18 = smov (!%p421_p8, %s425_s18), %s424_s12 }
  0x12   : > { %v1978_v16 = vunpack.c.l.bf16 %v1992_v13  ;;  %v1979_v17 = vunpack.c.h.bf16 %v1992_v13  ;;  %v1986_v18 = vunpack.c.l.bf16 %v1994_v9  ;;  %v1987_v19 = vunpack.c.h.bf16 %v1994_v9  ;;  %s2774_s30 = smov (!%p381_p6, %s1863_s30), 63  ;;  %s1876_s25 = smin.u32 %s437_s24, %s2430_s23 }
  0x13   : > { %v558_v20 = vmul.f32 %v1974_v10, %v2369_v6  ;;  %v559_v21 = vmul.f32 %v1975_v11, %v2369_v6  ;;  %v562_v22 = vmul.f32 %v1982_v12, %v2369_v6  ;;  %v563_v23 = vmul.f32 %v1983_v14, %v2369_v6  ;;  %s2776_s11 = smov (!%p401_p7, %s1868_s11), 63  ;;  %s1864_s13 = sshll.u32 %s2774_s30, 2 }
  0x14   : > { %v560_v24 = vmul.f32 %v1978_v16, %v2369_v6  ;;  %v561_v25 = vmul.f32 %v1979_v17, %v2369_v6  ;;  %v564_v26 = vmul.f32 %v1986_v18, %v2369_v6  ;;  %v565_v27 = vmul.f32 %v1987_v19, %v2369_v6  ;;  %s384_s16 = scalar_lea.vmem %s2758_s0, %s1864_s13  ;;  %s1869_s17 = sshll.u32 %s2776_s11, 2 }
  0x15   : > { %v2391_v28 = vadd.f32 %v2376_v15, %v558_v20  ;;  %v2394_v29 = vadd.f32 %v2376_v15, %v559_v21  ;;  %v2397_v30 = vadd.f32 %v2376_v15, %v562_v22  ;;  %v2406_v33 = vadd.f32 %v2376_v15, %v563_v23  ;;  %v1969_v40 = vld [vmem:[%s384_s16] sm:$0xff]   ;;  %s404_s22 = scalar_lea.vmem %s2760_s2, %s1869_s17  ;;  %s439_s26 = sand.u32 3, %s1876_s25  }
  0x16   : > { %v2400_v31 = vadd.f32 %v2376_v15, %v560_v24  ;;  %v2403_v32 = vadd.f32 %v2376_v15, %v561_v25  ;;  %v2411_v36 = vadd.f32 %v2376_v15, %v564_v26  ;;  %v2414_v37 = vadd.f32 %v2376_v15, %v565_v27  ;;  %v1989_v47 = vld [vmem:[%s404_s22] sm:$0xff]   ;;  %s440_s29 = ssub.s32 0, %s439_s26  ;;  %p1875_p10 = scmp.lt.s32.totalorder %s2778_s18, 0 }
  0x17   : > { %v1885_v34 = vmul.f32 -1.442695, %v2391_v28  ;;  %v1886_v35 = vmul.f32 -1.442695, %v2394_v29  ;;  %v1889_v41 = vmul.f32 -1.442695, %v2397_v30  ;;  %v1970_v42 = vunpack.c.l.bf16 %v1969_v40  ;;  %s2780_s29 = smov (!%p436_p9, %s440_s29), %s439_s26 }
  0x18   : > { %v1887_v38 = vmul.f32 -1.442695, %v2400_v31  ;;  %v1888_v39 = vmul.f32 -1.442695, %v2403_v32  ;;  %v1971_v43 = vunpack.c.h.bf16 %v1969_v40  ;;  %v1890_v44 = vmul.f32 -1.442695, %v2406_v33 }
  0x19   : > { %2214 = vpow2.f32 %v1885_v34  ;;  %v1891_v45 = vmul.f32 -1.442695, %v2411_v36  ;;  %v1892_v46 = vmul.f32 -1.442695, %v2414_v37  ;;  %v461_v48 = vmul.f32 %v1970_v42, %v2369_v6  ;;  %s431_s30 = sadd.s32 4, %s2778_s18  ;;  %p1878_p11 = scmp.lt.s32.totalorder %s2780_s29, 0 }
  0x1a   : > { %2216 = vpow2.f32 %v1886_v35  ;;  %v462_v49 = vmul.f32 %v1971_v43, %v2369_v6  ;;  %v1990_v50 = vunpack.c.l.bf16 %v1989_v47  ;;  %v1991_v51 = vunpack.c.h.bf16 %v1989_v47  ;;  %s446_s10 = sadd.s32 4, %s2780_s29  ;;  %s2782_s30 = smov (!%p1875_p10, %s431_s30), %s2778_s18 }
  0x1b   : > { %2218 = vpow2.f32 %v1887_v38  ;;  %v2444_v52 = vadd.f32 %v2376_v15, %v461_v48  ;;  %v489_v9 = vlaneseq  ;;  %s2784_s10 = smov (!%p1878_p11, %s446_s10), %s2780_s29  ;;  %p433_p12 = scmp.eq.s32.totalorder %s2782_s30, 0  ;;  %v2481_v35 = vsel %vm823_vm0, %v2354_v5, 0 }
  0x1c   : > { %2220 = vpow2.f32 %v1888_v39  ;;  %v2447_v53 = vadd.f32 %v2376_v15, %v462_v49  ;;  %v746_v54 = vmul.f32 %v1990_v50, %v2369_v6  ;;  %v747_v55 = vmul.f32 %v1991_v51, %v2369_v6  ;;  %p448_p13 = scmp.eq.s32.totalorder %s2784_s10, 0  ;;  %s2715_s30 = scalar_lea.vmem %s2765_s7, %s1866_s19 }
  0x1d   : > { %2222 = vpow2.f32 %v1889_v41  ;;  %v1881_v56 = vmul.f32 -1.442695, %v2444_v52  ;;  %v2470_v17 = vshrl.u32 %v489_v9, 7  ;;  %s2472_s11 = scalar_select %p433_p12, 0.0, 1.0 }
  0x1e   : > { %2224 = vpow2.f32 %v1890_v44  ;;  %v1882_v57 = vmul.f32 -1.442695, %v2447_v53  ;;  %v2456_v58 = vadd.f32 %v2376_v15, %v746_v54  ;;  %v2461_v59 = vadd.f32 %v2376_v15, %v747_v55  ;;  %s2477_s12 = scalar_select %p448_p13, 0.0, 1.0 }
  0x1f   : > { %2226 = vpow2.f32 %v1891_v45  ;;  %v2475_v25 = vadd.s32 8, %v2470_v17  ;;  %v486_v43 = vstv %s2472_s11  ;;  %vm492_vm5 = vcmp.gt.s32.totalorder %v2470_v17, 0  ;;  %p416_p0 = scmp.lt.s32.totalorder %s2321_s28, 7 }
  0x20   : > { %2228 = vpow2.f32 %v1892_v46  ;;  %v1895_v60 = vmul.f32 -1.442695, %v2456_v58  ;;  %v1896_v62 = vmul.f32 -1.442695, %v2461_v59  ;;  %v771_v44 = vstv %s2477_s12 }
  0x21   : > { %2230 = vpow2.f32 %v1881_v56  ;;  %vm513_vm4 = vcmp.lt.s32.totalorder %v2475_v25, 15  ;;  %s2786_s28 = smov (!%p416_p0, %s2321_s28), 7 }
  0x22   : > { %2232 = vpow2.f32 %v1882_v57  ;;  %s1872_s9 = sshll.u32 %s2786_s28, 1 }
  0x23   : > { %v2215_v61 = vpop.eup %2214  ;;  %2234 = vpow2.f32 %v1895_v60  ;;  %s419_s11 = scalar_lea.vmem %s2766_s8, %s1872_s9 }
  0x24   : > { %v2217_v63 = vpop.eup %2216  ;;  %v605_v2 = vadd.f32 1.0, %v2215_v61  ;;  %2236 = vpow2.f32 %v1896_v62 }
  0x25   : > { %v2219_v4 = vpop.eup %2218  ;;  %v606_v6 = vadd.f32 1.0, %v2217_v63 }
  0x26   : > { %v2221_v7 = vpop.eup %2220  ;;  %2238 = vrcp.f32 %v605_v2  ;;  %v607_v8 = vadd.f32 1.0, %v2219_v4 }
  0x27   : > { %v2223_v10 = vpop.eup %2222  ;;  %2240 = vrcp.f32 %v606_v6  ;;  %v608_v11 = vadd.f32 1.0, %v2221_v7 }
  0x28   : > { %v2225_v12 = vpop.eup %2224  ;;  %2242 = vrcp.f32 %v607_v8  ;;  %v609_v13 = vadd.f32 1.0, %v2223_v10 }
  0x29   : > { %v2227_v14 = vpop.eup %2226  ;;  %2244 = vrcp.f32 %v608_v11  ;;  %v610_v15 = vadd.f32 1.0, %v2225_v12 }
  0x2a   : > { %v2229_v16 = vpop.eup %2228  ;;  %2246 = vrcp.f32 %v609_v13  ;;  %v611_v18 = vadd.f32 1.0, %v2227_v14 }
  0x2b   : > { %2248 = vrcp.f32 %v610_v15  ;;  %v612_v19 = vadd.f32 1.0, %v2229_v16  ;;  %v2231_v20 = vpop.eup %2230 }
  0x2c   : > { %2250 = vrcp.f32 %v611_v18  ;;  %v2233_v21 = vpop.eup %2232  ;;  %v478_v22 = vadd.f32 1.0, %v2231_v20 }
  0x2d   : > { %2252 = vrcp.f32 %v612_v19  ;;  %v2235_v23 = vpop.eup %2234  ;;  %v479_v24 = vadd.f32 1.0, %v2233_v21 }
  0x2e   : > { %v2237_v26 = vpop.eup %2236  ;;  %2254 = vrcp.f32 %v478_v22  ;;  %v763_v27 = vadd.f32 1.0, %v2235_v23 }
  0x2f   : > { %2256 = vrcp.f32 %v479_v24  ;;  %v764_v40 = vadd.f32 1.0, %v2237_v26 }
  0x30   : > { %v2239_v34 = vpop.eup %2238  ;;  %2258 = vrcp.f32 %v763_v27 }
  0x31   : > { %v2241_v38 = vpop.eup %2240  ;;  %v2484_v39 = vmul.f32 %v2239_v34, %v2391_v28  ;;  %2260 = vrcp.f32 %v764_v40 }
  0x32   : > { %v2243_v41 = vpop.eup %2242  ;;  %v630_v42 = vmul.f32 %v2241_v38, %v2394_v29 }
  0x33   : > { %v2245_v45 = vpop.eup %2244  ;;  %v647_v46 = vrot.slane %v2484_v39, 7  ;;  %v2492_v5 = vmul.f32 %v2243_v41, %v2400_v31  ;;  %v686_v47 = vrot.slane %v2484_v39, 1 }
  0x34   : > { %v2247_v28 = vpop.eup %2246  ;;  %v648_v48 = vrot.slane %v630_v42, 7  ;;  %v682_v49 = vpack.c.bf16 %v630_v42, %v2484_v39  ;;  %v2497_v50 = vmul.f32 %v2245_v45, %v2403_v32  ;;  %v687_v29 = vrot.slane %v630_v42, 1 }
  0x35   : > { %v2249_v51 = vpop.eup %2248  ;;  %v689_v54 = vrot.slane %v2492_v5, 1  ;;  %v2502_v55 = vmul.f32 %v2247_v28, %v2397_v30  ;;  %v650_v31 = vrot.slane %v2492_v5, 7 }
  0x36   : > { %v2251_v56 = vpop.eup %2250  ;;  %727 = vst.msk [vmem:[#allocation2 + $0x38] sm:$0xff] %vm529_vm1, %v682_v49  ;;  %v683_v57 = vpack.c.bf16 %v2497_v50, %v2492_v5  ;;  %v688_v32 = vsel %vm514_vm2, %v686_v47, %v687_v29  ;;  %v691_v60 = vrot.slane %v2497_v50, 1  ;;  %v2511_v61 = vmul.f32 %v2249_v51, %v2406_v33  ;;  %v1926_v49 = vld [vmem:[%s2763_s5 + $0xc] sm:$0x3] }
  0x37   : > { %v2253_v62 = vpop.eup %2252  ;;  %v690_v30 = vsel %vm514_vm2, %v687_v29, %v689_v54  ;;  %v693_v63 = vrot.slane %v2502_v55, 1  ;;  %v2516_v2 = vmul.f32 %v2251_v56, %v2411_v36  ;;  %v649_v4 = vsel %vm498_vm3, %v647_v46, %v648_v48 }
  0x38   : > { %728 = vst.msk [vmem:[#allocation2 + $0x40] sm:$0xff] %vm529_vm1, %v683_v57  ;;  %v712_v6 = vsel %vm513_vm4, %v690_v30, 0.0  ;;  %v692_v33 = vsel %vm514_vm2, %v689_v54, %v691_v60  ;;  %v656_v7 = vrot.slane %v2511_v61, 7  ;;  %v684_v8 = vpack.c.bf16 %v2511_v61, %v2502_v55  ;;  %v2255_v9 = vpop.eup %2254 }
  0x39   : > { %v719_v10 = vpack.c.bf16 %v712_v6, %v688_v32  ;;  %v694_v36 = vsel %vm514_vm2, %v691_v60, %v693_v63  ;;  %v695_v11 = vrot.slane %v2511_v61, 1  ;;  %v697_v12 = vrot.slane %v2516_v2, 1  ;;  %v2257_v13 = vpop.eup %2256 }
  0x3a   : > { %v484_v14 = vmul.f32 %v2255_v9, %v2444_v52  ;;  %v714_v15 = vsel %vm513_vm4, %v694_v36, 0.0  ;;  %729 = vst.msk [vmem:[#allocation2 + $0x48] sm:$0xff] %vm529_vm1, %v684_v8  ;;  %v2536_v16 = vmul.f32 %v2253_v62, %v2414_v37  ;;  %v651_v18 = vsel %vm498_vm3, %v648_v48, %v650_v31  ;;  %v2259_v26 = vpop.eup %2258 }
  0x3b   : > { %v485_v19 = vmul.f32 %v2257_v13, %v2447_v53  ;;  %731 = vst.msk [vmem:[#allocation2 + $0x68] sm:$0xff] %vm529_vm1, %v719_v10  ;;  %v720_v20 = vpack.c.bf16 %v714_v15, %v692_v33  ;;  %v696_v21 = vsel %vm514_vm2, %v693_v63, %v695_v11  ;;  %v698_v22 = vsel %vm514_vm2, %v695_v11, %v697_v12  ;;  %v2261_v5 = vpop.eup %2260 }
  0x3c   : > { %v2543_v52 = vmul.f32 %v486_v43, %v484_v14  ;;  %v716_v23 = vsel %vm513_vm4, %v698_v22, 0.0  ;;  %v699_v24 = vrot.slane %v2536_v16, 1  ;;  %v638_v37 = vrot.slane %v2536_v16, 7  ;;  %v1906_v22 = vld [vmem:[%s2763_s5 + $0x4] sm:$0x3] }
  0x3d   : > { %v2549_v27 = vld [vmem:[#allocation2 + $0x38] sm:$0xff]  ;;  %v488_v53 = vmul.f32 %v486_v43, %v485_v19  ;;  %732 = vst.msk [vmem:[#allocation2 + $0x70] sm:$0xff] %vm529_vm1, %v720_v20  ;;  %v721_v34 = vpack.c.bf16 %v716_v23, %v696_v21  ;;  %v652_v38 = vrot.slane %v2497_v50, 7  ;;  %v672_v40 = vsel %vm492_vm5, %v651_v18, 0.0 }
  0x3e   : > { %2082 = vmatprep.mubr.msk.bf16.mxu0 %vm529_vm1, %v2549_v27  ;;  %v700_v41 = vsel %vm514_vm2, %v697_v12, %v699_v24  ;;  %v710_v42 = vsel %vm514_vm2, %v699_v24, %v686_v47  ;;  %v499_v45 = vrot.slane %v2543_v52, 7  ;;  %v669_v43 = vsel %vm498_vm3, %v638_v37, %v647_v46 }
  0x3f   : > { %v2563_v28 = vld [vmem:[#allocation2 + $0x40] sm:$0xff]  ;;  %v511_v48 = vpack.c.bf16 %v488_v53, %v2543_v52  ;;  %733 = vst.msk [vmem:[#allocation2 + $0x78] sm:$0xff] %vm529_vm1, %v721_v34  ;;  %v718_v47 = vsel %vm513_vm4, %v710_v42, 0.0  ;;  %v495_v50 = vrot.slane %v488_v53, 7  ;;  %v670_v39 = vsel %vm492_vm5, %v669_v43, 0.0 }
  0x40   : > { %2083 = vmatmul.mubr.msk.bf16.vlgmr.msra.gmra.mrb[0].mxu0 %vm529_vm1, %v2563_v28  ;;  %v722_v46 = vpack.c.bf16 %v718_v47, %v700_v41  ;;  %v678_v29 = vpack.c.bf16 %v649_v4, %v670_v39  ;;  %v653_v51 = vsel %vm498_vm3, %v650_v31, %v652_v38  ;;  %v654_v54 = vrot.slane %v2502_v55, 7  ;;  %v1936_v39 = vld [vmem:[%s2763_s5 + $0x10] sm:$0x3] }
  0x41   : > { %532 = vst.msk [vmem:[#allocation2 + $0x30] sm:$0xff] %vm529_vm1, %v511_v48  ;;  %2091 = vmatpush3.bf16.msra.mxu0 %v2481_v35  ;;  %v500_v56 = vsel %vm498_vm3, %v499_v45, %v495_v50  ;;  %v503_v57 = vsel %vm498_vm3, %v495_v50, %v499_v45  ;;  %v679_v32 = vpack.c.bf16 %v653_v51, %v672_v40  ;;  %v658_v60 = vrot.slane %v2516_v2, 7  ;;  %v808_v17 = vld [vmem:[#allocation2 + $0x48] sm:$0xff] }
  0x42   : > { %v2583_v62 = vld [vmem:[#allocation2 + $0x68] sm:$0xff]  ;;  %2203 = vmatprep.subr.msk.bf16.mxu0 %vm823_vm0, %v1926_v49  ;;  %734 = vst.msk [vmem:[#allocation2 + $0x80] sm:$0xff] %vm529_vm1, %v722_v46  ;;  %v508_v55 = vsel %vm492_vm5, %v503_v57, 0.0  ;;  %723 = vst.msk [vmem:[#allocation2 + $0x8] sm:$0xff] %vm529_vm1, %v678_v29  ;;  %v655_v35 = vsel %vm498_vm3, %v652_v38, %v654_v54  ;;  %v657_v31 = vsel %vm498_vm3, %v654_v54, %v656_v7  ;;  %v515_v11 = vrot.slane %v2543_v52, 1 }
  0x43   : > { %v769_v30 = vmul.f32 %v2259_v26, %v2456_v58  ;;  %2092 = vmatprep.mubr.msk.bf16.mxu0 %vm529_vm1, %v2583_v62  ;;  %v510_v63 = vpack.c.bf16 %v500_v56, %v508_v55  ;;  %724 = vst.msk [vmem:[#allocation2 + $0x10] sm:$0xff] %vm529_vm1, %v679_v32  ;;  %v674_v4 = vsel %vm492_vm5, %v655_v35, 0.0  ;;  %v659_v6 = vsel %vm498_vm3, %v656_v7, %v658_v60 }
  0x44   : > { %v660_v33 = vsel %vm498_vm3, %v658_v60, %v638_v37  ;;  %v680_v8 = vpack.c.bf16 %v657_v31, %v674_v4  ;;  %v676_v58 = vsel %vm492_vm5, %v659_v6, 0.0  ;;  %v770_v9 = vmul.f32 %v2261_v5, %v2461_v59  ;;  %v2625_v21 = vld [vmem:[#allocation2 + $0x70] sm:$0xff] }
  0x45   : > { %v772_v10 = vmul.f32 %v771_v44, %v769_v30  ;;  %530 = vst.msk [vmem:[#allocation2] sm:$0xff] %vm529_vm1, %v510_v63  ;;  %v681_v36 = vpack.c.bf16 %v660_v33, %v676_v58  ;;  %v516_v12 = vrot.slane %v488_v53, 1  ;;  %v685_v61 = vpack.c.bf16 %v2536_v16, %v2516_v2 }
  0x46   : > { %725 = vst.msk [vmem:[#allocation2 + $0x18] sm:$0xff] %vm529_vm1, %v680_v8  ;;  %v773_v7 = vmul.f32 %v771_v44, %v770_v9  ;;  %v905_v59 = vsel %vm823_vm0, %v2345_v3, 0  ;;  %v1367_v3 = vsel %vm823_vm0, %v1926_v49, 0  ;;  %v2633_v23 = vld [vmem:[#allocation2 + $0x78] sm:$0xff]  ;;  %v991_v5 = vsel %vm823_vm0, %v1906_v22, 0 }
  0x47   : > { %v778_v13 = vrot.slane %v772_v10, 7  ;;  %v787_v14 = vrot.slane %v772_v10, 1  ;;  %726 = vst.msk [vmem:[#allocation2 + $0x20] sm:$0xff] %vm529_vm1, %v681_v36  ;;  %v517_v15 = vsel %vm514_vm2, %v515_v11, %v516_v12  ;;  %v521_v18 = vsel %vm514_vm2, %v516_v12, %v515_v11  ;;  %730 = vst.msk [vmem:[#allocation2 + $0x50] sm:$0xff] %vm529_vm1, %v685_v61  ;;  %v1911_v49 = vld [vmem:[%s2763_s5 + $0x6] sm:$0x3] }
  0x48   : > { %v805_v19 = vld [vmem:[#allocation2 + $0x30] sm:$0xff]  ;;  %v775_v20 = vrot.slane %v773_v7, 7  ;;  %v527_v2 = vsel %vm513_vm4, %v521_v18, 0.0  ;;  %v786_v16 = vpack.c.bf16 %v773_v7, %v772_v10  ;;  %v788_v44 = vrot.slane %v773_v7, 1 }
  0x49   : > { %2042 = vmatprep.mubr.msk.bf16.mxu1 %vm529_vm1, %v805_v19  ;;  %v528_v52 = vpack.c.bf16 %v527_v2, %v517_v15  ;;  %v1257_v42 = vld [vmem:[#allocation2 + $0x80] sm:$0xff]  ;;  %v801_v43 = vld [vmem:[#allocation2 + $0x8] sm:$0xff]  ;;  %v1085_v51 = vsel %vm823_vm0, %v1911_v49, 0  ;;  %v1555_v56 = vsel %vm823_vm0, %v1936_v39, 0 }
  0x4a   : > { %2043 = vmatmul.mubr.msk.bf16.vlgmr.msra.gmra.mrb[0].mxu1 %vm529_vm1, %v2549_v27  ;;  %v779_v24 = vsel %vm498_vm3, %v778_v13, %v775_v20  ;;  %v782_v37 = vsel %vm498_vm3, %v775_v20, %v778_v13  ;;  %798 = vst.msk [vmem:[#allocation2 + $0x58] sm:$0xff] %vm529_vm1, %v786_v16  ;;  %v789_v26 = vsel %vm514_vm2, %v787_v14, %v788_v44  ;;  %v1931_v27 = vld [vmem:[%s2763_s5 + $0xe] sm:$0x3]  ;;  %v1348_v45 = vld [vmem:[#allocation2 + $0x10] sm:$0xff] }
  0x4b   : > { %v793_v53 = vsel %vm514_vm2, %v788_v44, %v787_v14  ;;  %2051 = vmatpush3.bf16.msra.mxu1 %v905_v59  ;;  %2046 = vmatprep.mubr.msk.bf16.mxu1 %vm529_vm1, %v2563_v28  ;;  %v783_v34 = vsel %vm492_vm5, %v782_v37, 0.0  ;;  %534 = vst.msk [vmem:[#allocation2 + $0x60] sm:$0xff] %vm529_vm1, %v528_v52  ;;  %v1461_v50 = vsel %vm823_vm0, %v1931_v27, 0 }
  0x4c   : > { %v795_v38 = vsel %vm513_vm4, %v793_v53, 0.0  ;;  %2093 = vmatmul.mubr.msk.bf16.vlgmr.msra.gmra.mrb[0].mxu0 %vm529_vm1, %v2625_v21  ;;  %2198 = vmatprep.subr.msk.bf16.mxu1 %vm823_vm0, %v1906_v22  ;;  %v785_v40 = vpack.c.bf16 %v779_v24, %v783_v34  ;;  %v800_v25 = vld [vmem:[#allocation2] sm:$0xff] }
  0x4d   : > { %v796_v41 = vpack.c.bf16 %v795_v38, %v789_v26  ;;  %2096 = vmatprep.mubr.msk.bf16.mxu0 %vm529_vm1, %v2633_v23  ;;  %2101 = vmatpush3.bf16.msra.mxu0 %v1367_v3  ;;  %v1349_v48 = vld [vmem:[#allocation2 + $0x18] sm:$0xff] }
  0x4e   : > { %2204 = vmatprep.subr.msk.bf16.mxu0 %vm823_vm0, %v1931_v27  ;;  %797 = vst.msk [vmem:[#allocation2 + $0x28] sm:$0xff] %vm529_vm1, %v785_v40  ;;  %v1350_v47 = vld [vmem:[#allocation2 + $0x20] sm:$0xff]  ;;  %v1444_v54 = vld [vmem:[#allocation2 + $0x50] sm:$0xff] }
  0x4f   : > { %799 = vst.msk [vmem:[#allocation2 + $0x88] sm:$0xff] %vm529_vm1, %v796_v41 }
  0x52   : > { %2047 = vmatmul.mubr.msk.bf16.gmra.mrb[4].mxu1 %vm529_vm1, %v808_v17  ;;  %v972_v46 = vld [vmem:[#allocation2 + $0x60] sm:$0xff] }
  0x53   : > { %2052 = vmatprep.mubr.msk.bf16.mxu1 %vm529_vm1, %v800_v25 }
  0x54   : > { %2097 = vmatmul.mubr.msk.bf16.gmra.mrb[4].mxu0 %vm529_vm1, %v1257_v42 }
  0x55   : > { %2102 = vmatprep.mubr.msk.bf16.mxu0 %vm529_vm1, %v1348_v45  ;;  %v1351_v29 = vld [vmem:[#allocation2 + $0x28] sm:$0xff] }
  0x5a   : > { %2053 = vmatmul.mubr.msk.bf16.vlgmr.msra.gmra.mrb[0].mxu1 %vm529_vm1, %v801_v43 }
  0x5b   : > { %2061 = vmatpush3.bf16.msra.mxu1 %v991_v5  ;;  %2056 = vmatprep.mubr.msk.bf16.mxu1 %vm529_vm1, %v1348_v45 }
  0x5c   : > { %2103 = vmatmul.mubr.msk.bf16.vlgmr.msra.gmra.mrb[0].mxu0 %vm529_vm1, %v1349_v48  ;;  %2199 = vmatprep.subr.msk.bf16.mxu1 %vm823_vm0, %v1911_v49 }
  0x5d   : > { %2106 = vmatprep.mubr.msk.bf16.mxu0 %vm529_vm1, %v1350_v47  ;;  %2111 = vmatpush3.bf16.msra.mxu0 %v1461_v50 }
  0x5e   : > { %2205 = vmatprep.subr.msk.bf16.mxu0 %vm823_vm0, %v1936_v39 }
  0x62   : > { %2057 = vmatmul.mubr.msk.bf16.gmra.mrb[4].mxu1 %vm529_vm1, %v1349_v48 }
  0x63   : > { %2062 = vmatprep.mubr.msk.bf16.mxu1 %vm529_vm1, %v972_v46 }
  0x64   : > { %2107 = vmatmul.mubr.msk.bf16.gmra.mrb[4].mxu0 %vm529_vm1, %v1351_v29 }
  0x65   : > { %2112 = vmatprep.mubr.msk.bf16.mxu0 %vm529_vm1, %v2563_v28  ;;  %v1445_v28 = vld [vmem:[#allocation2 + $0x58] sm:$0xff] }
  0x6a   : > { %2063 = vmatmul.mubr.msk.bf16.vlgmr.msra.gmra.mrb[0].mxu1 %vm529_vm1, %v2583_v62  ;;  %v1941_v62 = vld [vmem:[%s2764_s6] ss:$0 sm:$0xff] }
  0x6b   : > { %2071 = vmatpush3.bf16.msra.mxu1 %v1085_v51  ;;  %2066 = vmatprep.mubr.msk.bf16.mxu1 %vm529_vm1, %v2625_v21 }
  0x6c   : > { %2113 = vmatmul.mubr.msk.bf16.vlgmr.msra.gmra.mrb[0].mxu0 %vm529_vm1, %v808_v17  ;;  %2201 = vmatprep.subr.msk.bf16.mxu1 %vm823_vm0, %v2328_v0  ;;  %v1539_v0 = vld [vmem:[#allocation2 + $0x88] sm:$0xff] }
  0x6d   : > { %2116 = vmatprep.mubr.msk.bf16.mxu0 %vm529_vm1, %v1444_v54  ;;  %2121 = vmatpush3.bf16.msra.mxu0 %v1555_v56 }
  0x72   : > { %2067 = vmatmul.mubr.msk.bf16.gmra.mrb[4].mxu1 %vm529_vm1, %v2633_v23 }
  0x73   : > { %2072 = vmatprep.mubr.msk.bf16.mxu1 %vm529_vm1, %v801_v43 }
  0x74   : > { %2117 = vmatmul.mubr.msk.bf16.gmra.mrb[4].mxu0 %vm529_vm1, %v1445_v28 }
  0x75   : > { %2122 = vmatprep.mubr.msk.bf16.mxu0 %vm529_vm1, %v2625_v21 }
  0x7a   : > { %2073 = vmatmul.mubr.msk.bf16.vlgmr.msra.gmra.mrb[0].mxu1 %vm529_vm1, %v1348_v45 }
  0x7b   : > { %2131 = vmatpush3.bf16.msra.mxu1 %v2336_v1  ;;  %2076 = vmatprep.mubr.msk.bf16.mxu1 %vm529_vm1, %v1349_v48 }
  0x7c   : > { %2123 = vmatmul.mubr.msk.bf16.vlgmr.msra.gmra.mrb[0].mxu0 %vm529_vm1, %v2633_v23 }
  0x7d   : > { %2126 = vmatprep.mubr.msk.bf16.mxu0 %vm529_vm1, %v1257_v42 }
  0x82   : > { %2077 = vmatmul.mubr.msk.bf16.gmra.mrb[4].mxu1 %vm529_vm1, %v1350_v47 }
  0x83   : > { %2086 = vmatprep.mubr.msk.bf16.mxu1 %vm529_vm1, %v808_v17 }
  0x84   : > { %2127 = vmatmul.mubr.msk.bf16.gmra.mrb[4].mxu0 %vm529_vm1, %v1539_v0 }
  0x8e   : > { %2087 = vmatmul.mubr.msk.bf16.vlgmr.msra.gmra.mrb[4].mxu1 %vm529_vm1, %v1444_v54 }
 0x14d   : > { %v2074_v57 = vpop.f32.mrb[0].mxu1 }
 0x14e   : > { %v1121_v32 = vpop.f32.mrb[1].mxu1 }
 0x14f   : > { %v2075_v1 = vpop.f32.mrb[2].mxu1  ;;  %v2124_v60 = vpop.f32.mrb[0].mxu0 }
 0x150   : > { %v1124_v55 = vpop.f32.mrb[3].mxu1  ;;  %v2132_v35 = vadd.f32 %v2124_v60, %v2074_v57  ;;  %v1591_v31 = vpop.f32.mrb[1].mxu0 }
 0x151   : > { %v2133_v30 = vadd.f32 %v1591_v31, %v1121_v32  ;;  %v2125_v63 = vpop.f32.mrb[2].mxu0 }
 0x152   : > { %v1639_v4 = vadd.f32 %v2132_v35, %v1941_v62  ;;  %v2134_v6 = vadd.f32 %v2125_v63, %v2075_v1  ;;  %v1594_v33 = vpop.f32.mrb[3].mxu0 }
 0x153   : > { %v1637_v8 = vadd.f32 %v2133_v30, %v1941_v62  ;;  %v2135_v58 = vadd.f32 %v1594_v33, %v1124_v55 }
 0x154   : > { %v1962_v9 = vpack.c.bf16 %v1639_v4, %v1639_v4  ;;  %v1640_v10 = vadd.f32 %v2134_v6, %v1941_v62  ;;  %v1709_v61 = vmul.f32 %v1639_v4, %v1639_v4  ;;  %v1689_v2 = vsel %vm529_vm1, %v1639_v4, 0.0 }
 0x155   : > { %v1960_v36 = vpack.c.bf16 %v1637_v8, %v1637_v8  ;;  %v1707_v11 = vmul.f32 %v1637_v8, %v1637_v8  ;;  %v1638_v12 = vadd.f32 %v2135_v58, %v1941_v62  ;;  %v1686_v13 = vsel %vm529_vm1, %v1637_v8, 0.0 }
 0x156   : > { %1680 = vst.msk [vmem:[%s2715_s30 + $0x8] sm:$0xf] %vm1677_vm6, %v1962_v9  ;;  %v1963_v7 = vpack.c.bf16 %v1640_v10, %v1640_v10  ;;  %v1710_v44 = vmul.f32 %v1640_v10, %v1640_v10  ;;  %v1718_v24 = vsel %vm529_vm1, %v1709_v61, 0.0  ;;  %v1691_v37 = vsel %vm529_vm1, %v1640_v10, 0.0 }
 0x157   : > { %1678 = vst.msk [vmem:[%s2715_s30] sm:$0xf] %vm1677_vm6, %v1960_v36  ;;  %v1961_v14 = vpack.c.bf16 %v1638_v12, %v1638_v12  ;;  %v1687_v59 = vsel %vm529_vm1, %v1638_v12, 0.0  ;;  %v1708_v15 = vmul.f32 %v1638_v12, %v1638_v12  ;;  %v2128_v18 = vpop.f32.mrb[4].mxu0  ;;  %v1715_v16 = vsel %vm529_vm1, %v1707_v11, 0.0 }
 0x158   : > { %1681 = vst.msk [vmem:[%s2715_s30 + $0xc] sm:$0xf] %vm1677_vm6, %v1963_v7  ;;  %v1688_v19 = vadd.f32 %v1687_v59, %v1686_v13  ;;  %v1607_v20 = vpop.f32.mrb[5].mxu0  ;;  %v1720_v27 = vsel %vm529_vm1, %v1710_v44, 0.0 }
 0x159   : > { %1679 = vst.msk [vmem:[%s2715_s30 + $0x4] sm:$0xf] %vm1677_vm6, %v1961_v14  ;;  %v1716_v21 = vsel %vm529_vm1, %v1708_v15, 0.0  ;;  %v2129_v3 = vpop.f32.mrb[6].mxu0 }
 0x15a   : > { %v1690_v22 = vadd.f32 %v1689_v2, %v1688_v19  ;;  %v1717_v52 = vadd.f32 %v1716_v21, %v1715_v16  ;;  %v1610_v23 = vpop.f32.mrb[7].mxu0 }
 0x15c   : > { %v1719_v26 = vadd.f32 %v1718_v24, %v1717_v52  ;;  %v1692_v53 = vadd.f32 %v1691_v37, %v1690_v22 }
 0x15e   : > { %v1721_v34 = vadd.f32 %v1720_v27, %v1719_v26 }
 0x161   : > { %v2088_v38 = vpop.f32.mrb[4].mxu1 }
 0x162   : > { %v2136_v40 = vadd.f32 %v2128_v18, %v2088_v38  ;;  %v1231_v41 = vpop.f32.mrb[5].mxu1 }
 0x163   : > { %v2137_v17 = vadd.f32 %v1607_v20, %v1231_v41  ;;  %v2089_v25 = vpop.f32.mrb[6].mxu1 }
 0x164   : > { %v1643_v42 = vadd.f32 %v2136_v40, %v1941_v62  ;;  %v2138_v45 = vadd.f32 %v2129_v3, %v2089_v25  ;;  %v1234_v43 = vpop.f32.mrb[7].mxu1 }
 0x165   : > { %v1641_v5 = vadd.f32 %v2137_v17, %v1941_v62  ;;  %v2139_v48 = vadd.f32 %v1610_v23, %v1234_v43 }
 0x166   : > { %v1966_v49 = vpack.c.bf16 %v1643_v42, %v1643_v42  ;;  %v1644_v47 = vadd.f32 %v2138_v45, %v1941_v62  ;;  %v1713_v57 = vmul.f32 %v1643_v42, %v1643_v42 }
 0x167   : > { %v1964_v50 = vpack.c.bf16 %v1641_v5, %v1641_v5  ;;  %v1693_v39 = vsel %vm529_vm1, %v1641_v5, 0.0  ;;  %v1711_v46 = vmul.f32 %v1641_v5, %v1641_v5  ;;  %v1642_v29 = vadd.f32 %v2139_v48, %v1941_v62 }
 0x168   : > { %1684 = vst.msk [vmem:[%s2715_s30 + $0x18] sm:$0xf] %vm1677_vm6, %v1966_v49  ;;  %v1694_v51 = vadd.f32 %v1693_v39, %v1692_v53  ;;  %v1967_v54 = vpack.c.bf16 %v1644_v47, %v1644_v47  ;;  %v1697_v62 = vsel %vm529_vm1, %v1643_v42, 0.0  ;;  %v1714_v55 = vmul.f32 %v1644_v47, %v1644_v47 }
 0x169   : > { %1682 = vst.msk [vmem:[%s2715_s30 + $0x10] sm:$0xf] %vm1677_vm6, %v1964_v50  ;;  %v1722_v56 = vsel %vm529_vm1, %v1711_v46, 0.0  ;;  %v1965_v28 = vpack.c.bf16 %v1642_v29, %v1642_v29  ;;  %v1695_v0 = vsel %vm529_vm1, %v1642_v29, 0.0  ;;  %v1712_v60 = vmul.f32 %v1642_v29, %v1642_v29 }
 0x16a   : > { %v1723_v32 = vadd.f32 %v1722_v56, %v1721_v34  ;;  %1685 = vst.msk [vmem:[%s2715_s30 + $0x1c] sm:$0xf] %vm1677_vm6, %v1967_v54  ;;  %v1696_v1 = vadd.f32 %v1695_v0, %v1694_v51  ;;  %v1699_v30 = vsel %vm529_vm1, %v1644_v47, 0.0  ;;  %v1726_v4 = vsel %vm529_vm1, %v1713_v57, 0.0 }
 0x16b   : > { %1683 = vst.msk [vmem:[%s2715_s30 + $0x14] sm:$0xf] %vm1677_vm6, %v1965_v28  ;;  %v1724_v31 = vsel %vm529_vm1, %v1712_v60, 0.0  ;;  %v1728_v8 = vsel %vm529_vm1, %v1714_v55, 0.0 }
 0x16c   : > { %v1698_v35 = vadd.f32 %v1697_v62, %v1696_v1  ;;  %v1725_v63 = vadd.f32 %v1724_v31, %v1723_v32 }
 0x16e   : > { %v1700_v6 = vadd.f32 %v1699_v30, %v1698_v35  ;;  %v1727_v33 = vadd.f32 %v1726_v4, %v1725_v63 }
 0x170   : > { %v1701_v58 = vrot.slane %v1700_v6, 4  ;;  %v1729_v9 = vadd.f32 %v1728_v8, %v1727_v33 }
 0x172   : > { %v1702_v10 = vadd.f32 %v1701_v58, %v1700_v6  ;;  %v1730_v36 = vrot.slane %v1729_v9, 4 }
 0x174   : > { %v1703_v11 = vrot.slane %v1702_v10, 2  ;;  %v1731_v12 = vadd.f32 %v1730_v36, %v1729_v9 }
 0x176   : > { %v1704_v61 = vadd.f32 %v1703_v11, %v1702_v10  ;;  %v1732_v7 = vrot.slane %v1731_v12, 2 }
 0x178   : > { %v1705_v13 = vrot.slane %v1704_v61, 1  ;;  %v1733_v14 = vadd.f32 %v1732_v7, %v1731_v12 }
 0x17a   : > { %v1734_v59 = vrot.slane %v1733_v14, 1  ;;  %v1706_v15 = vadd.f32 %v1705_v13, %v1704_v61 }
 0x17c   : > { %v1735_v18 = vadd.f32 %v1734_v59, %v1733_v14 }
 0x17e   : > { %v1736_v19 = vsel %vm498_vm3, %v1706_v15, %v1735_v18 }
 0x17f   : > { %1738 = vst.msk [vmem:[%s419_s11] sm:$0x3] %vm1737_vm7, %v1736_v19 }
 0x180 PF: > { %s19_s27 = sadd.s32 1, %s2268_s27  }
 0x181   : > { %p16_p1 = scmp.ge.s32.totalorder %s19_s27, 10  }
 0x183   :  { %18 = sbr.rel (!%p16_p1) target bundleno = 1 (0x1), region = 106 }

// kernel: res_block_2d.5
= control target key start
LH: loop header
LB: loop body
LE: loop exit
PB: predicated region body
PF: predicated region fallthrough
CT: control target
= control target key end

     0   :  { %s125_s0 = inlined_call_operand.vmem [shape: bf16[16,128], index: 0, kind: input, shape index: {}]   ;;  %s126_s2 = inlined_call_operand.vmem [shape: f32[1,128], index: 2, kind: input, shape index: {}]   ;;  %s127_s3 = inlined_call_operand.vmem [shape: f32[1,128], index: 3, kind: input, shape index: {}]   ;;  %s128_s1 = inlined_call_operand.vmem [shape: f32[16,128], index: 1, kind: input, shape index: {}]   ;;  %s129_s4 = inlined_call_operand.vmem [shape: f32[16,128], index: 4, kind: output, shape index: {}]  }
   0x1   :  { %v68_v0 = vld [vmem:[%s125_s0] sm:$0xff]   ;;  %v40_v8 = vld [vmem:[%s128_s1 + $0x8] sm:$0xff] }
   0x2   :  { %v63_v1 = vld [vmem:[%s126_s2] ss:$0 sm:$0xff]  ;;  %v69_v2 = vunpack.c.l.bf16 %v68_v0  ;;  %v70_v3 = vunpack.c.h.bf16 %v68_v0 }
   0x3   :  { %v64_v4 = vld [vmem:[%s127_s3] ss:$0 sm:$0xff] }
   0x4   :  { %v28_v5 = vmul.f32 %v69_v2, %v63_v1  ;;  %v29_v6 = vmul.f32 %v70_v3, %v63_v1  ;;  %v39_v7 = vld [vmem:[%s128_s1] sm:$0xff] }
   0x6   :  { %v37_v9 = vadd.f32 %v64_v4, %v28_v5  ;;  %v38_v10 = vadd.f32 %v64_v4, %v29_v6 }
   0x8   :  { %v41_v11 = vadd.f32 %v39_v7, %v37_v9  ;;  %v42_v12 = vadd.f32 %v40_v8, %v38_v10 }
   0xa   :  { %v65_v13 = vmul.f32 -1.442695, %v41_v11  ;;  %v66_v14 = vmul.f32 -1.442695, %v42_v12 }
   0xc   :  { %71 = vpow2.f32 %v65_v13 }
   0xd   :  { %73 = vpow2.f32 %v66_v14 }
  0x16   :  { %v72_v15 = vpop.eup %71 }
  0x17   :  { %v74_v16 = vpop.eup %73  ;;  %v49_v17 = vadd.f32 1.0, %v72_v15 }
  0x18   :  { %v50_v18 = vadd.f32 1.0, %v74_v16 }
  0x19   :  { %75 = vrcp.f32 %v49_v17 }
  0x1a   :  { %77 = vrcp.f32 %v50_v18 }
  0x23   :  { %v76_v19 = vpop.eup %75 }
  0x24   :  { %v78_v20 = vpop.eup %77  ;;  %v55_v21 = vmul.f32 %v76_v19, %v41_v11 }
  0x25   :  { %v56_v22 = vmul.f32 %v78_v20, %v42_v12 }
  0x26   :  { %57 = vst [vmem:[%s129_s4] sm:$0xff] %v55_v21 }
  0x27   :  { %58 = vst [vmem:[%s129_s4 + $0x8] sm:$0xff] %v56_v22 }

</bundles_post_ra>
